<compile_context>
chip_gen: v5e
topology: v5e:2x2
jax: 0.10.0
libtpu: 0.0.40
codegen_flags: <defaults>
</compile_context>

<pallas_src>
import functools

import jax
import jax.numpy as jnp
from jax.experimental import pallas as pl
from jax.experimental.pallas import tpu as pltpu


def _mha_flash_kernel(xq_ref, xkv_ref, wq_ref, wk_ref, wv_ref, wo_ref,
                      bq_ref, bk_ref, bv_ref, bo_ref, o_ref,
                      q_scr, m_scr, l_scr, acc_scr,
                      *, num_heads, head_dim, compute_dtype, approx_recip):
    ki = pl.program_id(2)
    scale = 1.0 / (head_dim ** 0.5)

    # ---- once per (batch, q-tile): scaled Q projection + accumulator init ----
    @pl.when(ki == 0)
    def _init():
        xq = xq_ref[0]                                            # (TQ, E)
        for h in range(num_heads):                                # leading-axis index only
            qh = jnp.dot(xq, wq_ref[h],
                         preferred_element_type=jnp.float32)      # (TQ, D) f32
            q_scr[h] = ((qh + bq_ref[h]) * scale).astype(compute_dtype)
        m_scr[...] = jnp.full(m_scr.shape, -jnp.inf, jnp.float32)
        l_scr[...] = jnp.zeros(l_scr.shape, jnp.float32)
        acc_scr[...] = jnp.zeros(acc_scr.shape, jnp.float32)

    # ---- every kv step: head-major K/V projection for this kv tile ----
    xkv = xkv_ref[0]                                              # (TKV, E)
    k_heads, v_heads = [], []
    for h in range(num_heads):
        kh = jnp.dot(xkv, wk_ref[h], preferred_element_type=jnp.float32) + bk_ref[h]
        vh = jnp.dot(xkv, wv_ref[h], preferred_element_type=jnp.float32) + bv_ref[h]
        k_heads.append(kh.astype(compute_dtype))
        v_heads.append(vh.astype(compute_dtype))
    k = jnp.stack(k_heads, axis=0)                                # (H, TKV, D)
    v = jnp.stack(v_heads, axis=0)                                # (H, TKV, D)

    # ---- batched-over-heads scores + online softmax update ----
    q = q_scr[...]                                                # (H, TQ, D)
    s = jnp.einsum('hqd,hkd->hqk', q, k,
                   preferred_element_type=jnp.float32)            # (H, TQ, TKV) f32

    m_prev = m_scr[...]
    m_new = jnp.maximum(m_prev, jnp.max(s, axis=-1, keepdims=True))
    alpha = jnp.exp(m_prev - m_new)
    p = jnp.exp(s - m_new)
    l_scr[...] = alpha * l_scr[...] + jnp.sum(p, axis=-1, keepdims=True)
    acc_scr[...] = alpha * acc_scr[...] + jnp.einsum(
        'hqk,hkd->hqd', p.astype(compute_dtype), v,
        preferred_element_type=jnp.float32)
    m_scr[...] = m_new

    # ---- last kv step: normalize, output projection, lane-dense store ----
    @pl.when(ki == pl.num_programs(2) - 1)
    def _finalize():
        inv_l = pl.reciprocal(l_scr[...], approx=approx_recip)    # EUP slot
        ctx = (acc_scr[...] * inv_l).astype(compute_dtype)        # (H, TQ, D)
        out = None
        for h in range(num_heads):     # out = sum_h ctx_h @ Wo[h*D:(h+1)*D, :]
            part = jnp.dot(ctx[h], wo_ref[h],
                           preferred_element_type=jnp.float32)    # (TQ, E_pad)
            out = part if out is None else out + part
        o_ref[0] = (out + bo_ref[...]).astype(o_ref.dtype)


def prepare_params(params, num_heads, compute_dtype=jnp.bfloat16):
    """One-time (outside the hot path) re-layout of PyTorch-convention Linear
    weights into the head-major, lane-dense layout the kernel consumes."""
    E = params["wq"].shape[0]
    assert E % num_heads == 0
    H, D = num_heads, E // num_heads
    E_pad = ((E + 127) // 128) * 128          # lane-dense output width

    def per_head_in(w):                       # torch (out, in) -> (H, E, D)
        wt = w.T                              # (E_in, E_out = H*D)
        return wt.reshape(E, H, D).transpose(1, 0, 2).astype(compute_dtype)

    wo_t = params["wo"].T                     # (E_in = H*D, E_out = E)
    wo_pad = jnp.pad(wo_t, ((0, 0), (0, E_pad - E)))
    wo_h = wo_pad.reshape(H, D, E_pad).astype(compute_dtype)

    def bias_h(b):                            # (E,) -> (H, 1, D), kept in f32
        return b.reshape(H, 1, D).astype(jnp.float32)

    bo_pad = jnp.pad(params["bo"], (0, E_pad - E)).reshape(1, E_pad).astype(jnp.float32)

    return {
        "wq": per_head_in(params["wq"]), "wk": per_head_in(params["wk"]),
        "wv": per_head_in(params["wv"]), "wo": wo_h,
        "bq": bias_h(params["bq"]), "bk": bias_h(params["bk"]),
        "bv": bias_h(params["bv"]), "bo": bo_pad,
        "E": E, "E_pad": E_pad, "H": H, "D": D,
        "compute_dtype": compute_dtype,
    }


def self_attention_pallas(x, prep, *, q_tile=128, kv_tile=512):
    """x: (B, S, E) float32. prep: output of prepare_params."""
    B, S, E = x.shape
    H, D, E_pad = prep["H"], prep["D"], prep["E_pad"]
    cdt = prep["compute_dtype"]
    assert prep["E"] == E

    tq = min(q_tile, S)
    tkv = min(kv_tile, S)
    assert S % tq == 0 and S % tkv == 0, "S must be divisible by the tile sizes"

    approx_recip = jnp.dtype(cdt) != jnp.dtype(jnp.float32)
    x_c = x.astype(cdt)                        # halves HBM traffic on bf16 path

    kernel = functools.partial(
        _mha_flash_kernel, num_heads=H, head_dim=D,
        compute_dtype=cdt, approx_recip=bool(approx_recip))

    grid = (B, S // tq, S // tkv)
    full3 = lambda b, qi, ki: (0, 0, 0)

    out = pl.pallas_call(
        kernel,
        out_shape=jax.ShapeDtypeStruct((B, S, E_pad), x.dtype),
        grid_spec=pltpu.PrefetchScalarGridSpec(
            num_scalar_prefetch=0,
            grid=grid,
            in_specs=[
                pl.BlockSpec((1, tq, E), lambda b, qi, ki: (b, qi, 0)),    # x (query rows)
                pl.BlockSpec((1, tkv, E), lambda b, qi, ki: (b, ki, 0)),   # x (key/value rows)
                pl.BlockSpec((H, E, D), full3),                            # Wq (head-major)
                pl.BlockSpec((H, E, D), full3),                            # Wk
                pl.BlockSpec((H, E, D), full3),                            # Wv
                pl.BlockSpec((H, D, E_pad), full3),                        # Wo (lane-padded)
                pl.BlockSpec((H, 1, D), full3),                            # bq
                pl.BlockSpec((H, 1, D), full3),                            # bk
                pl.BlockSpec((H, 1, D), full3),                            # bv
                pl.BlockSpec((1, E_pad), lambda b, qi, ki: (0, 0)),        # bo
            ],
            out_specs=pl.BlockSpec((1, tq, E_pad), lambda b, qi, ki: (b, qi, 0)),
            scratch_shapes=[
                pltpu.VMEM((H, tq, D), cdt),           # scaled Q, persists over kv steps
                pltpu.VMEM((H, tq, 1), jnp.float32),   # running max m
                pltpu.VMEM((H, tq, 1), jnp.float32),   # running denom l
                pltpu.VMEM((H, tq, D), jnp.float32),   # running numerator acc
            ],
        ),
        compiler_params=pltpu.CompilerParams(
            dimension_semantics=("parallel", "parallel", "arbitrary"),
            vmem_limit_bytes=56 * 1024 * 1024,          # v7x-safe explicit budget
        ),
    )(x_c, x_c, prep["wq"], prep["wk"], prep["wv"], prep["wo"],
      prep["bq"], prep["bk"], prep["bv"], prep["bo"])

    return out[..., :E] if E_pad != E else out


def self_attention_ref(x, params, num_heads):
    """Pure-JAX reference mirroring the PyTorch forward (mask=None)."""
    B, S, E = x.shape
    D = E // num_heads
    lin = lambda t, w, b: t @ w.T + b
    q = lin(x, params["wq"], params["bq"]).reshape(B, S, num_heads, D).transpose(0, 2, 1, 3)
    k = lin(x, params["wk"], params["bk"]).reshape(B, S, num_heads, D).transpose(0, 2, 1, 3)
    v = lin(x, params["wv"], params["bv"]).reshape(B, S, num_heads, D).transpose(0, 2, 1, 3)
    scores = jnp.einsum("bhqd,bhkd->bhqk", q, k) / (D ** 0.5)
    w = jax.nn.softmax(scores, axis=-1)
    ctx = jnp.einsum("bhqk,bhkd->bhqd", w, v).transpose(0, 2, 1, 3).reshape(B, S, E)
    return lin(ctx, params["wo"], params["bo"])


if __name__ == "__main__":
    B, S, E, H = 2, 8, 32, 4

    key = jax.random.PRNGKey(0)
    keys = jax.random.split(key, 9)
    bound = 1.0 / jnp.sqrt(E)
    params = {
        "wq": jax.random.uniform(keys[0], (E, E), jnp.float32, -bound, bound),
        "bq": jax.random.uniform(keys[1], (E,), jnp.float32, -bound, bound),
        "wk": jax.random.uniform(keys[2], (E, E), jnp.float32, -bound, bound),
        "bk": jax.random.uniform(keys[3], (E,), jnp.float32, -bound, bound),
        "wv": jax.random.uniform(keys[4], (E, E), jnp.float32, -bound, bound),
        "bv": jax.random.uniform(keys[5], (E,), jnp.float32, -bound, bound),
        "wo": jax.random.uniform(keys[6], (E, E), jnp.float32, -bound, bound),
        "bo": jax.random.uniform(keys[7], (E,), jnp.float32, -bound, bound),
    }
    x = jax.random.normal(keys[8], (B, S, E), jnp.float32)

    ref = self_attention_ref(x, params, H)

    # f32 compute path (tight correctness check).
    prep_f32 = prepare_params(params, H, compute_dtype=jnp.float32)
    out_f32 = jax.block_until_ready(self_attention_pallas(x, prep_f32))
    assert out_f32.shape == (B, S, E)
    assert jnp.allclose(out_f32, ref, atol=1e-3, rtol=1e-3), "f32 path mismatch vs reference"

    # bf16 MXU path (review: bf16 inputs, f32 accumulation) — looser tolerance.
    prep_bf16 = prepare_params(params, H, compute_dtype=jnp.bfloat16)
    out_bf16 = jax.block_until_ready(self_attention_pallas(x, prep_bf16))
    assert out_bf16.shape == (B, S, E)
    assert jnp.allclose(out_bf16, ref, atol=5e-2, rtol=5e-2), "bf16 path mismatch vs reference"

    print("KERNEL_OK")
</pallas_src>

<mosaic_0001>
module attributes {stable_mosaic.version = 11 : i64} {
  func.func @_mha_flash_kernel(%arg0: i32, %arg1: i32, %arg2: i32, %arg3: memref<1x8x32xf32, #tpu.memory_space<vmem>>, %arg4: memref<1x8x32xf32, #tpu.memory_space<vmem>>, %arg5: memref<4x32x8xf32, #tpu.memory_space<vmem>>, %arg6: memref<4x32x8xf32, #tpu.memory_space<vmem>>, %arg7: memref<4x32x8xf32, #tpu.memory_space<vmem>>, %arg8: memref<4x8x128xf32, #tpu.memory_space<vmem>>, %arg9: memref<4x1x8xf32, #tpu.memory_space<vmem>>, %arg10: memref<4x1x8xf32, #tpu.memory_space<vmem>>, %arg11: memref<4x1x8xf32, #tpu.memory_space<vmem>>, %arg12: memref<1x128xf32, #tpu.memory_space<vmem>>, %arg13: memref<1x8x128xf32, #tpu.memory_space<vmem>>, %arg14: memref<4x8x8xf32, #tpu.memory_space<vmem>>, %arg15: memref<4x8x1xf32, #tpu.memory_space<vmem>>, %arg16: memref<4x8x1xf32, #tpu.memory_space<vmem>>, %arg17: memref<4x8x8xf32, #tpu.memory_space<vmem>>) attributes {dimension_semantics = [#tpu.dimension_semantics<parallel>, #tpu.dimension_semantics<parallel>, #tpu.dimension_semantics<arbitrary>], iteration_bounds = array<i64: 2, 1, 1>, scalar_prefetch = 0 : i64, scratch_operands = 4 : i64, tpu.core_type = #tpu.core_type<tc>, window_params = [{transform_indices = @transform_0, window_bounds = array<i64: 1, 8, 32>}, {transform_indices = @transform_1, window_bounds = array<i64: 1, 8, 32>}, {pipeline_mode = #tpu.pipeline_mode<synchronous>, transform_indices = @transform_2, window_bounds = array<i64: 4, 32, 8>}, {pipeline_mode = #tpu.pipeline_mode<synchronous>, transform_indices = @transform_3, window_bounds = array<i64: 4, 32, 8>}, {pipeline_mode = #tpu.pipeline_mode<synchronous>, transform_indices = @transform_4, window_bounds = array<i64: 4, 32, 8>}, {pipeline_mode = #tpu.pipeline_mode<synchronous>, transform_indices = @transform_5, window_bounds = array<i64: 4, 8, 128>}, {pipeline_mode = #tpu.pipeline_mode<synchronous>, transform_indices = @transform_6, window_bounds = array<i64: 4, 1, 8>}, {pipeline_mode = #tpu.pipeline_mode<synchronous>, transform_indices = @transform_7, window_bounds = array<i64: 4, 1, 8>}, {pipeline_mode = #tpu.pipeline_mode<synchronous>, transform_indices = @transform_8, window_bounds = array<i64: 4, 1, 8>}, {pipeline_mode = #tpu.pipeline_mode<synchronous>, transform_indices = @transform_9, window_bounds = array<i64: 1, 128>}, {transform_indices = @transform_10, window_bounds = array<i64: 1, 8, 128>}]} {
    %c0_i32 = arith.constant 0 : i32
    %0 = arith.cmpi eq, %arg2, %c0_i32 : i32
    %1 = arith.extui %0 : i1 to i32
    %c0_i32_0 = arith.constant 0 : i32
    %2 = arith.cmpi ne, %1, %c0_i32_0 : i32
    scf.if %2 {
      %c0_82 = arith.constant 0 : index
      %c0_83 = arith.constant 0 : index
      %c0_84 = arith.constant 0 : index
      %98 = vector.load %arg3[%c0_82, %c0_83, %c0_84] : memref<1x8x32xf32, #tpu.memory_space<vmem>>, vector<1x8x32xf32>
      %99 = vector.shape_cast %98 : vector<1x8x32xf32> to vector<8x32xf32>
      %c0_85 = arith.constant 0 : index
      %c0_86 = arith.constant 0 : index
      %c0_87 = arith.constant 0 : index
      %100 = vector.load %arg5[%c0_85, %c0_86, %c0_87] : memref<4x32x8xf32, #tpu.memory_space<vmem>>, vector<1x32x8xf32>
      %101 = vector.shape_cast %100 : vector<1x32x8xf32> to vector<32x8xf32>
      %cst_88 = arith.constant dense<0.000000e+00> : vector<8x8xf32>
      %102 = tpu.matmul %99, %101, %cst_88 {dimension_numbers = #tpu.dot_dimension_numbers<[1], [0], [0], [1], [0, 0, 1, 1], [], []>} : vector<8x32xf32>, vector<32x8xf32>, vector<8x8xf32> -> vector<8x8xf32>
      %c0_89 = arith.constant 0 : index
      %c0_90 = arith.constant 0 : index
      %c0_91 = arith.constant 0 : index
      %103 = vector.load %arg9[%c0_89, %c0_90, %c0_91] : memref<4x1x8xf32, #tpu.memory_space<vmem>>, vector<1x1x8xf32>
      %104 = vector.shape_cast %103 : vector<1x1x8xf32> to vector<1x8xf32>
      %105 = vector.broadcast %104 : vector<1x8xf32> to vector<8x8xf32>
      %106 = arith.addf %102, %105 : vector<8x8xf32>
      %cst_92 = arith.constant 0.353553385 : f32
      %107 = vector.broadcast %cst_92 : f32 to vector<8x8xf32>
      %108 = arith.mulf %106, %107 : vector<8x8xf32>
      %c0_93 = arith.constant 0 : index
      %c0_94 = arith.constant 0 : index
      %c0_95 = arith.constant 0 : index
      %109 = vector.load %arg14[%c0_93, %c0_94, %c0_95] : memref<4x8x8xf32, #tpu.memory_space<vmem>>, vector<1x8x8xf32>
      %110 = vector.shape_cast %109 : vector<1x8x8xf32> to vector<8x8xf32>
      %111 = vector.shape_cast %108 : vector<8x8xf32> to vector<1x8x8xf32>
      tpu.vector_store %arg14[%c0_93, %c0_94, %c0_95], %111 {strides = array<i32>} : memref<4x8x8xf32, #tpu.memory_space<vmem>>, vector<1x8x8xf32>,
      %c1_96 = arith.constant 1 : index
      %c0_97 = arith.constant 0 : index
      %c0_98 = arith.constant 0 : index
      %112 = vector.load %arg5[%c1_96, %c0_97, %c0_98] : memref<4x32x8xf32, #tpu.memory_space<vmem>>, vector<1x32x8xf32>
      %113 = vector.shape_cast %112 : vector<1x32x8xf32> to vector<32x8xf32>
      %cst_99 = arith.constant dense<0.000000e+00> : vector<8x8xf32>
      %114 = tpu.matmul %99, %113, %cst_99 {dimension_numbers = #tpu.dot_dimension_numbers<[1], [0], [0], [1], [0, 0, 1, 1], [], []>} : vector<8x32xf32>, vector<32x8xf32>, vector<8x8xf32> -> vector<8x8xf32>
      %c1_100 = arith.constant 1 : index
      %c0_101 = arith.constant 0 : index
      %c0_102 = arith.constant 0 : index
      %115 = vector.load %arg9[%c1_100, %c0_101, %c0_102] : memref<4x1x8xf32, #tpu.memory_space<vmem>>, vector<1x1x8xf32>
      %116 = vector.shape_cast %115 : vector<1x1x8xf32> to vector<1x8xf32>
      %117 = vector.broadcast %116 : vector<1x8xf32> to vector<8x8xf32>
      %118 = arith.addf %114, %117 : vector<8x8xf32>
      %cst_103 = arith.constant 0.353553385 : f32
      %119 = vector.broadcast %cst_103 : f32 to vector<8x8xf32>
      %120 = arith.mulf %118, %119 : vector<8x8xf32>
      %c1_104 = arith.constant 1 : index
      %c0_105 = arith.constant 0 : index
      %c0_106 = arith.constant 0 : index
      %121 = vector.load %arg14[%c1_104, %c0_105, %c0_106] : memref<4x8x8xf32, #tpu.memory_space<vmem>>, vector<1x8x8xf32>
      %122 = vector.shape_cast %121 : vector<1x8x8xf32> to vector<8x8xf32>
      %123 = vector.shape_cast %120 : vector<8x8xf32> to vector<1x8x8xf32>
      tpu.vector_store %arg14[%c1_104, %c0_105, %c0_106], %123 {strides = array<i32>} : memref<4x8x8xf32, #tpu.memory_space<vmem>>, vector<1x8x8xf32>,
      %c2_107 = arith.constant 2 : index
      %c0_108 = arith.constant 0 : index
      %c0_109 = arith.constant 0 : index
      %124 = vector.load %arg5[%c2_107, %c0_108, %c0_109] : memref<4x32x8xf32, #tpu.memory_space<vmem>>, vector<1x32x8xf32>
      %125 = vector.shape_cast %124 : vector<1x32x8xf32> to vector<32x8xf32>
      %cst_110 = arith.constant dense<0.000000e+00> : vector<8x8xf32>
      %126 = tpu.matmul %99, %125, %cst_110 {dimension_numbers = #tpu.dot_dimension_numbers<[1], [0], [0], [1], [0, 0, 1, 1], [], []>} : vector<8x32xf32>, vector<32x8xf32>, vector<8x8xf32> -> vector<8x8xf32>
      %c2_111 = arith.constant 2 : index
      %c0_112 = arith.constant 0 : index
      %c0_113 = arith.constant 0 : index
      %127 = vector.load %arg9[%c2_111, %c0_112, %c0_113] : memref<4x1x8xf32, #tpu.memory_space<vmem>>, vector<1x1x8xf32>
      %128 = vector.shape_cast %127 : vector<1x1x8xf32> to vector<1x8xf32>
      %129 = vector.broadcast %128 : vector<1x8xf32> to vector<8x8xf32>
      %130 = arith.addf %126, %129 : vector<8x8xf32>
      %cst_114 = arith.constant 0.353553385 : f32
      %131 = vector.broadcast %cst_114 : f32 to vector<8x8xf32>
      %132 = arith.mulf %130, %131 : vector<8x8xf32>
      %c2_115 = arith.constant 2 : index
      %c0_116 = arith.constant 0 : index
      %c0_117 = arith.constant 0 : index
      %133 = vector.load %arg14[%c2_115, %c0_116, %c0_117] : memref<4x8x8xf32, #tpu.memory_space<vmem>>, vector<1x8x8xf32>
      %134 = vector.shape_cast %133 : vector<1x8x8xf32> to vector<8x8xf32>
      %135 = vector.shape_cast %132 : vector<8x8xf32> to vector<1x8x8xf32>
      tpu.vector_store %arg14[%c2_115, %c0_116, %c0_117], %135 {strides = array<i32>} : memref<4x8x8xf32, #tpu.memory_space<vmem>>, vector<1x8x8xf32>,
      %c3_118 = arith.constant 3 : index
      %c0_119 = arith.constant 0 : index
      %c0_120 = arith.constant 0 : index
      %136 = vector.load %arg5[%c3_118, %c0_119, %c0_120] : memref<4x32x8xf32, #tpu.memory_space<vmem>>, vector<1x32x8xf32>
      %137 = vector.shape_cast %136 : vector<1x32x8xf32> to vector<32x8xf32>
      %cst_121 = arith.constant dense<0.000000e+00> : vector<8x8xf32>
      %138 = tpu.matmul %99, %137, %cst_121 {dimension_numbers = #tpu.dot_dimension_numbers<[1], [0], [0], [1], [0, 0, 1, 1], [], []>} : vector<8x32xf32>, vector<32x8xf32>, vector<8x8xf32> -> vector<8x8xf32>
      %c3_122 = arith.constant 3 : index
      %c0_123 = arith.constant 0 : index
      %c0_124 = arith.constant 0 : index
      %139 = vector.load %arg9[%c3_122, %c0_123, %c0_124] : memref<4x1x8xf32, #tpu.memory_space<vmem>>, vector<1x1x8xf32>
      %140 = vector.shape_cast %139 : vector<1x1x8xf32> to vector<1x8xf32>
      %141 = vector.broadcast %140 : vector<1x8xf32> to vector<8x8xf32>
      %142 = arith.addf %138, %141 : vector<8x8xf32>
      %cst_125 = arith.constant 0.353553385 : f32
      %143 = vector.broadcast %cst_125 : f32 to vector<8x8xf32>
      %144 = arith.mulf %142, %143 : vector<8x8xf32>
      %c3_126 = arith.constant 3 : index
      %c0_127 = arith.constant 0 : index
      %c0_128 = arith.constant 0 : index
      %145 = vector.load %arg14[%c3_126, %c0_127, %c0_128] : memref<4x8x8xf32, #tpu.memory_space<vmem>>, vector<1x8x8xf32>
      %146 = vector.shape_cast %145 : vector<1x8x8xf32> to vector<8x8xf32>
      %147 = vector.shape_cast %144 : vector<8x8xf32> to vector<1x8x8xf32>
      tpu.vector_store %arg14[%c3_126, %c0_127, %c0_128], %147 {strides = array<i32>} : memref<4x8x8xf32, #tpu.memory_space<vmem>>, vector<1x8x8xf32>,
      %cst_129 = arith.constant 0xFF800000 : f32
      %148 = vector.broadcast %cst_129 : f32 to vector<4x8x1xf32>
      %c0_130 = arith.constant 0 : index
      %c0_131 = arith.constant 0 : index
      %c0_132 = arith.constant 0 : index
      %149 = vector.load %arg15[%c0_130, %c0_131, %c0_132] : memref<4x8x1xf32, #tpu.memory_space<vmem>>, vector<4x8x1xf32>
      tpu.vector_store %arg15[%c0_130, %c0_131, %c0_132], %148 {strides = array<i32>} : memref<4x8x1xf32, #tpu.memory_space<vmem>>, vector<4x8x1xf32>,
      %cst_133 = arith.constant 0.000000e+00 : f32
      %150 = vector.broadcast %cst_133 : f32 to vector<4x8x1xf32>
      %c0_134 = arith.constant 0 : index
      %c0_135 = arith.constant 0 : index
      %c0_136 = arith.constant 0 : index
      %151 = vector.load %arg16[%c0_134, %c0_135, %c0_136] : memref<4x8x1xf32, #tpu.memory_space<vmem>>, vector<4x8x1xf32>
      tpu.vector_store %arg16[%c0_134, %c0_135, %c0_136], %150 {strides = array<i32>} : memref<4x8x1xf32, #tpu.memory_space<vmem>>, vector<4x8x1xf32>,
      %cst_137 = arith.constant 0.000000e+00 : f32
      %152 = vector.broadcast %cst_137 : f32 to vector<4x8x8xf32>
      %c0_138 = arith.constant 0 : index
      %c0_139 = arith.constant 0 : index
      %c0_140 = arith.constant 0 : index
      %153 = vector.load %arg17[%c0_138, %c0_139, %c0_140] : memref<4x8x8xf32, #tpu.memory_space<vmem>>, vector<4x8x8xf32>
      tpu.vector_store %arg17[%c0_138, %c0_139, %c0_140], %152 {strides = array<i32>} : memref<4x8x8xf32, #tpu.memory_space<vmem>>, vector<4x8x8xf32>,
    } else {
    }
    %c0 = arith.constant 0 : index
    %c0_1 = arith.constant 0 : index
    %c0_2 = arith.constant 0 : index
    %3 = vector.load %arg4[%c0, %c0_1, %c0_2] : memref<1x8x32xf32, #tpu.memory_space<vmem>>, vector<1x8x32xf32>
    %4 = vector.shape_cast %3 : vector<1x8x32xf32> to vector<8x32xf32>
    %c0_3 = arith.constant 0 : index
    %c0_4 = arith.constant 0 : index
    %c0_5 = arith.constant 0 : index
    %5 = vector.load %arg6[%c0_3, %c0_4, %c0_5] : memref<4x32x8xf32, #tpu.memory_space<vmem>>, vector<1x32x8xf32>
    %6 = vector.shape_cast %5 : vector<1x32x8xf32> to vector<32x8xf32>
    %cst = arith.constant dense<0.000000e+00> : vector<8x8xf32>
    %7 = tpu.matmul %4, %6, %cst {dimension_numbers = #tpu.dot_dimension_numbers<[1], [0], [0], [1], [0, 0, 1, 1], [], []>} : vector<8x32xf32>, vector<32x8xf32>, vector<8x8xf32> -> vector<8x8xf32>
    %c0_6 = arith.constant 0 : index
    %c0_7 = arith.constant 0 : index
    %c0_8 = arith.constant 0 : index
    %8 = vector.load %arg10[%c0_6, %c0_7, %c0_8] : memref<4x1x8xf32, #tpu.memory_space<vmem>>, vector<1x1x8xf32>
    %9 = vector.shape_cast %8 : vector<1x1x8xf32> to vector<1x8xf32>
    %10 = vector.broadcast %9 : vector<1x8xf32> to vector<8x8xf32>
    %11 = arith.addf %7, %10 : vector<8x8xf32>
    %c0_9 = arith.constant 0 : index
    %c0_10 = arith.constant 0 : index
    %c0_11 = arith.constant 0 : index
    %12 = vector.load %arg7[%c0_9, %c0_10, %c0_11] : memref<4x32x8xf32, #tpu.memory_space<vmem>>, vector<1x32x8xf32>
    %13 = vector.shape_cast %12 : vector<1x32x8xf32> to vector<32x8xf32>
    %cst_12 = arith.constant dense<0.000000e+00> : vector<8x8xf32>
    %14 = tpu.matmul %4, %13, %cst_12 {dimension_numbers = #tpu.dot_dimension_numbers<[1], [0], [0], [1], [0, 0, 1, 1], [], []>} : vector<8x32xf32>, vector<32x8xf32>, vector<8x8xf32> -> vector<8x8xf32>
    %c0_13 = arith.constant 0 : index
    %c0_14 = arith.constant 0 : index
    %c0_15 = arith.constant 0 : index
    %15 = vector.load %arg11[%c0_13, %c0_14, %c0_15] : memref<4x1x8xf32, #tpu.memory_space<vmem>>, vector<1x1x8xf32>
    %16 = vector.shape_cast %15 : vector<1x1x8xf32> to vector<1x8xf32>
    %17 = vector.broadcast %16 : vector<1x8xf32> to vector<8x8xf32>
    %18 = arith.addf %14, %17 : vector<8x8xf32>
    %c1 = arith.constant 1 : index
    %c0_16 = arith.constant 0 : index
    %c0_17 = arith.constant 0 : index
    %19 = vector.load %arg6[%c1, %c0_16, %c0_17] : memref<4x32x8xf32, #tpu.memory_space<vmem>>, vector<1x32x8xf32>
    %20 = vector.shape_cast %19 : vector<1x32x8xf32> to vector<32x8xf32>
    %cst_18 = arith.constant dense<0.000000e+00> : vector<8x8xf32>
    %21 = tpu.matmul %4, %20, %cst_18 {dimension_numbers = #tpu.dot_dimension_numbers<[1], [0], [0], [1], [0, 0, 1, 1], [], []>} : vector<8x32xf32>, vector<32x8xf32>, vector<8x8xf32> -> vector<8x8xf32>
    %c1_19 = arith.constant 1 : index
    %c0_20 = arith.constant 0 : index
    %c0_21 = arith.constant 0 : index
    %22 = vector.load %arg10[%c1_19, %c0_20, %c0_21] : memref<4x1x8xf32, #tpu.memory_space<vmem>>, vector<1x1x8xf32>
    %23 = vector.shape_cast %22 : vector<1x1x8xf32> to vector<1x8xf32>
    %24 = vector.broadcast %23 : vector<1x8xf32> to vector<8x8xf32>
    %25 = arith.addf %21, %24 : vector<8x8xf32>
    %c1_22 = arith.constant 1 : index
    %c0_23 = arith.constant 0 : index
    %c0_24 = arith.constant 0 : index
    %26 = vector.load %arg7[%c1_22, %c0_23, %c0_24] : memref<4x32x8xf32, #tpu.memory_space<vmem>>, vector<1x32x8xf32>
    %27 = vector.shape_cast %26 : vector<1x32x8xf32> to vector<32x8xf32>
    %cst_25 = arith.constant dense<0.000000e+00> : vector<8x8xf32>
    %28 = tpu.matmul %4, %27, %cst_25 {dimension_numbers = #tpu.dot_dimension_numbers<[1], [0], [0], [1], [0, 0, 1, 1], [], []>} : vector<8x32xf32>, vector<32x8xf32>, vector<8x8xf32> -> vector<8x8xf32>
    %c1_26 = arith.constant 1 : index
    %c0_27 = arith.constant 0 : index
    %c0_28 = arith.constant 0 : index
    %29 = vector.load %arg11[%c1_26, %c0_27, %c0_28] : memref<4x1x8xf32, #tpu.memory_space<vmem>>, vector<1x1x8xf32>
    %30 = vector.shape_cast %29 : vector<1x1x8xf32> to vector<1x8xf32>
    %31 = vector.broadcast %30 : vector<1x8xf32> to vector<8x8xf32>
    %32 = arith.addf %28, %31 : vector<8x8xf32>
    %c2 = arith.constant 2 : index
    %c0_29 = arith.constant 0 : index
    %c0_30 = arith.constant 0 : index
    %33 = vector.load %arg6[%c2, %c0_29, %c0_30] : memref<4x32x8xf32, #tpu.memory_space<vmem>>, vector<1x32x8xf32>
    %34 = vector.shape_cast %33 : vector<1x32x8xf32> to vector<32x8xf32>
    %cst_31 = arith.constant dense<0.000000e+00> : vector<8x8xf32>
    %35 = tpu.matmul %4, %34, %cst_31 {dimension_numbers = #tpu.dot_dimension_numbers<[1], [0], [0], [1], [0, 0, 1, 1], [], []>} : vector<8x32xf32>, vector<32x8xf32>, vector<8x8xf32> -> vector<8x8xf32>
    %c2_32 = arith.constant 2 : index
    %c0_33 = arith.constant 0 : index
    %c0_34 = arith.constant 0 : index
    %36 = vector.load %arg10[%c2_32, %c0_33, %c0_34] : memref<4x1x8xf32, #tpu.memory_space<vmem>>, vector<1x1x8xf32>
    %37 = vector.shape_cast %36 : vector<1x1x8xf32> to vector<1x8xf32>
    %38 = vector.broadcast %37 : vector<1x8xf32> to vector<8x8xf32>
    %39 = arith.addf %35, %38 : vector<8x8xf32>
    %c2_35 = arith.constant 2 : index
    %c0_36 = arith.constant 0 : index
    %c0_37 = arith.constant 0 : index
    %40 = vector.load %arg7[%c2_35, %c0_36, %c0_37] : memref<4x32x8xf32, #tpu.memory_space<vmem>>, vector<1x32x8xf32>
    %41 = vector.shape_cast %40 : vector<1x32x8xf32> to vector<32x8xf32>
    %cst_38 = arith.constant dense<0.000000e+00> : vector<8x8xf32>
    %42 = tpu.matmul %4, %41, %cst_38 {dimension_numbers = #tpu.dot_dimension_numbers<[1], [0], [0], [1], [0, 0, 1, 1], [], []>} : vector<8x32xf32>, vector<32x8xf32>, vector<8x8xf32> -> vector<8x8xf32>
    %c2_39 = arith.constant 2 : index
    %c0_40 = arith.constant 0 : index
    %c0_41 = arith.constant 0 : index
    %43 = vector.load %arg11[%c2_39, %c0_40, %c0_41] : memref<4x1x8xf32, #tpu.memory_space<vmem>>, vector<1x1x8xf32>
    %44 = vector.shape_cast %43 : vector<1x1x8xf32> to vector<1x8xf32>
    %45 = vector.broadcast %44 : vector<1x8xf32> to vector<8x8xf32>
    %46 = arith.addf %42, %45 : vector<8x8xf32>
    %c3 = arith.constant 3 : index
    %c0_42 = arith.constant 0 : index
    %c0_43 = arith.constant 0 : index
    %47 = vector.load %arg6[%c3, %c0_42, %c0_43] : memref<4x32x8xf32, #tpu.memory_space<vmem>>, vector<1x32x8xf32>
    %48 = vector.shape_cast %47 : vector<1x32x8xf32> to vector<32x8xf32>
    %cst_44 = arith.constant dense<0.000000e+00> : vector<8x8xf32>
    %49 = tpu.matmul %4, %48, %cst_44 {dimension_numbers = #tpu.dot_dimension_numbers<[1], [0], [0], [1], [0, 0, 1, 1], [], []>} : vector<8x32xf32>, vector<32x8xf32>, vector<8x8xf32> -> vector<8x8xf32>
    %c3_45 = arith.constant 3 : index
    %c0_46 = arith.constant 0 : index
    %c0_47 = arith.constant 0 : index
    %50 = vector.load %arg10[%c3_45, %c0_46, %c0_47] : memref<4x1x8xf32, #tpu.memory_space<vmem>>, vector<1x1x8xf32>
    %51 = vector.shape_cast %50 : vector<1x1x8xf32> to vector<1x8xf32>
    %52 = vector.broadcast %51 : vector<1x8xf32> to vector<8x8xf32>
    %53 = arith.addf %49, %52 : vector<8x8xf32>
    %c3_48 = arith.constant 3 : index
    %c0_49 = arith.constant 0 : index
    %c0_50 = arith.constant 0 : index
    %54 = vector.load %arg7[%c3_48, %c0_49, %c0_50] : memref<4x32x8xf32, #tpu.memory_space<vmem>>, vector<1x32x8xf32>
    %55 = vector.shape_cast %54 : vector<1x32x8xf32> to vector<32x8xf32>
    %cst_51 = arith.constant dense<0.000000e+00> : vector<8x8xf32>
    %56 = tpu.matmul %4, %55, %cst_51 {dimension_numbers = #tpu.dot_dimension_numbers<[1], [0], [0], [1], [0, 0, 1, 1], [], []>} : vector<8x32xf32>, vector<32x8xf32>, vector<8x8xf32> -> vector<8x8xf32>
    %c3_52 = arith.constant 3 : index
    %c0_53 = arith.constant 0 : index
    %c0_54 = arith.constant 0 : index
    %57 = vector.load %arg11[%c3_52, %c0_53, %c0_54] : memref<4x1x8xf32, #tpu.memory_space<vmem>>, vector<1x1x8xf32>
    %58 = vector.shape_cast %57 : vector<1x1x8xf32> to vector<1x8xf32>
    %59 = vector.broadcast %58 : vector<1x8xf32> to vector<8x8xf32>
    %60 = arith.addf %56, %59 : vector<8x8xf32>
    %61 = vector.shape_cast %11 : vector<8x8xf32> to vector<1x8x8xf32>
    %62 = vector.shape_cast %25 : vector<8x8xf32> to vector<1x8x8xf32>
    %63 = vector.shape_cast %39 : vector<8x8xf32> to vector<1x8x8xf32>
    %64 = vector.shape_cast %53 : vector<8x8xf32> to vector<1x8x8xf32>
    %65 = tpu.concatenate %61, %62, %63, %64 in 0 : vector<1x8x8xf32>, vector<1x8x8xf32>, vector<1x8x8xf32>, vector<1x8x8xf32> -> vector<4x8x8xf32>
    %66 = vector.shape_cast %18 : vector<8x8xf32> to vector<1x8x8xf32>
    %67 = vector.shape_cast %32 : vector<8x8xf32> to vector<1x8x8xf32>
    %68 = vector.shape_cast %46 : vector<8x8xf32> to vector<1x8x8xf32>
    %69 = vector.shape_cast %60 : vector<8x8xf32> to vector<1x8x8xf32>
    %70 = tpu.concatenate %66, %67, %68, %69 in 0 : vector<1x8x8xf32>, vector<1x8x8xf32>, vector<1x8x8xf32>, vector<1x8x8xf32> -> vector<4x8x8xf32>
    %c0_55 = arith.constant 0 : index
    %c0_56 = arith.constant 0 : index
    %c0_57 = arith.constant 0 : index
    %71 = vector.load %arg14[%c0_55, %c0_56, %c0_57] : memref<4x8x8xf32, #tpu.memory_space<vmem>>, vector<4x8x8xf32>
    "tpu.trace_start"() <{level = 10 : i32, message = "hqd,hkd->hqk"}> : () -> ()
    %cst_58 = arith.constant dense<0.000000e+00> : vector<4x8x8xf32>
    %72 = tpu.matmul %71, %65, %cst_58 {dimension_numbers = #tpu.dot_dimension_numbers<[2], [2], [1], [1], [0, 0, 0, 1, 1, 1], [0], [0]>} : vector<4x8x8xf32>, vector<4x8x8xf32>, vector<4x8x8xf32> -> vector<4x8x8xf32>
    "tpu.trace_stop"() : () -> ()
    %c0_59 = arith.constant 0 : index
    %c0_60 = arith.constant 0 : index
    %c0_61 = arith.constant 0 : index
    %73 = vector.load %arg15[%c0_59, %c0_60, %c0_61] : memref<4x8x1xf32, #tpu.memory_space<vmem>>, vector<4x8x1xf32>
    %cst_62 = arith.constant dense<0xFF800000> : vector<4x8xf32>
    %74 = vector.multi_reduction <maximumf>, %72, %cst_62 [2] : vector<4x8x8xf32> to vector<4x8xf32>
    %75 = vector.shape_cast %74 : vector<4x8xf32> to vector<4x8x1xf32>
    %76 = arith.maximumf %73, %75 : vector<4x8x1xf32>
    %77 = arith.subf %73, %76 : vector<4x8x1xf32>
    %78 = math.exp %77 : vector<4x8x1xf32>
    %79 = vector.broadcast %76 : vector<4x8x1xf32> to vector<4x8x8xf32>
    %80 = arith.subf %72, %79 : vector<4x8x8xf32>
    %81 = math.exp %80 : vector<4x8x8xf32>
    %c0_63 = arith.constant 0 : index
    %c0_64 = arith.constant 0 : index
    %c0_65 = arith.constant 0 : index
    %82 = vector.load %arg16[%c0_63, %c0_64, %c0_65] : memref<4x8x1xf32, #tpu.memory_space<vmem>>, vector<4x8x1xf32>
    %83 = arith.mulf %78, %82 : vector<4x8x1xf32>
    %cst_66 = arith.constant dense<0.000000e+00> : vector<4x8xf32>
    %84 = vector.multi_reduction <add>, %81, %cst_66 [2] : vector<4x8x8xf32> to vector<4x8xf32>
    %85 = vector.shape_cast %84 : vector<4x8xf32> to vector<4x8x1xf32>
    %86 = arith.addf %83, %85 : vector<4x8x1xf32>
    %c0_67 = arith.constant 0 : index
    %c0_68 = arith.constant 0 : index
    %c0_69 = arith.constant 0 : index
    %87 = vector.load %arg16[%c0_67, %c0_68, %c0_69] : memref<4x8x1xf32, #tpu.memory_space<vmem>>, vector<4x8x1xf32>
    tpu.vector_store %arg16[%c0_67, %c0_68, %c0_69], %86 {strides = array<i32>} : memref<4x8x1xf32, #tpu.memory_space<vmem>>, vector<4x8x1xf32>,
    %c0_70 = arith.constant 0 : index
    %c0_71 = arith.constant 0 : index
    %c0_72 = arith.constant 0 : index
    %88 = vector.load %arg17[%c0_70, %c0_71, %c0_72] : memref<4x8x8xf32, #tpu.memory_space<vmem>>, vector<4x8x8xf32>
    %89 = vector.broadcast %78 : vector<4x8x1xf32> to vector<4x8x8xf32>
    %90 = arith.mulf %89, %88 : vector<4x8x8xf32>
    "tpu.trace_start"() <{level = 10 : i32, message = "hqk,hkd->hqd"}> : () -> ()
    %cst_73 = arith.constant dense<0.000000e+00> : vector<4x8x8xf32>
    %91 = tpu.matmul %81, %70, %cst_73 {dimension_numbers = #tpu.dot_dimension_numbers<[2], [1], [1], [2], [0, 0, 0, 1, 1, 2], [0], [0]>} : vector<4x8x8xf32>, vector<4x8x8xf32>, vector<4x8x8xf32> -> vector<4x8x8xf32>
    "tpu.trace_stop"() : () -> ()
    %92 = arith.addf %90, %91 : vector<4x8x8xf32>
    %c0_74 = arith.constant 0 : index
    %c0_75 = arith.constant 0 : index
    %c0_76 = arith.constant 0 : index
    %93 = vector.load %arg17[%c0_74, %c0_75, %c0_76] : memref<4x8x8xf32, #tpu.memory_space<vmem>>, vector<4x8x8xf32>
    tpu.vector_store %arg17[%c0_74, %c0_75, %c0_76], %92 {strides = array<i32>} : memref<4x8x8xf32, #tpu.memory_space<vmem>>, vector<4x8x8xf32>,
    %c0_77 = arith.constant 0 : index
    %c0_78 = arith.constant 0 : index
    %c0_79 = arith.constant 0 : index
    %94 = vector.load %arg15[%c0_77, %c0_78, %c0_79] : memref<4x8x1xf32, #tpu.memory_space<vmem>>, vector<4x8x1xf32>
    tpu.vector_store %arg15[%c0_77, %c0_78, %c0_79], %76 {strides = array<i32>} : memref<4x8x1xf32, #tpu.memory_space<vmem>>, vector<4x8x1xf32>,
    %c0_i32_80 = arith.constant 0 : i32
    %95 = arith.cmpi eq, %arg2, %c0_i32_80 : i32
    %96 = arith.extui %95 : i1 to i32
    %c0_i32_81 = arith.constant 0 : i32
    %97 = arith.cmpi ne, %96, %c0_i32_81 : i32
    scf.if %97 {
      %c0_82 = arith.constant 0 : index
      %c0_83 = arith.constant 0 : index
      %c0_84 = arith.constant 0 : index
      %98 = vector.load %arg16[%c0_82, %c0_83, %c0_84] : memref<4x8x1xf32, #tpu.memory_space<vmem>>, vector<4x8x1xf32>
      %99 = tpu.reciprocal %98 : vector<4x8x1xf32> -> vector<4x8x1xf32>
      %c0_85 = arith.constant 0 : index
      %c0_86 = arith.constant 0 : index
      %c0_87 = arith.constant 0 : index
      %100 = vector.load %arg17[%c0_85, %c0_86, %c0_87] : memref<4x8x8xf32, #tpu.memory_space<vmem>>, vector<4x8x8xf32>
      %101 = vector.broadcast %99 : vector<4x8x1xf32> to vector<4x8x8xf32>
      %102 = arith.mulf %100, %101 : vector<4x8x8xf32>
      %103 = vector.extract_strided_slice %102 {offsets = [0, 0, 0], sizes = [1, 8, 8], strides = [1, 1, 1]} : vector<4x8x8xf32> to vector<1x8x8xf32>
      %104 = vector.shape_cast %103 : vector<1x8x8xf32> to vector<8x8xf32>
      %c0_88 = arith.constant 0 : index
      %c0_89 = arith.constant 0 : index
      %c0_90 = arith.constant 0 : index
      %105 = vector.load %arg8[%c0_88, %c0_89, %c0_90] : memref<4x8x128xf32, #tpu.memory_space<vmem>>, vector<1x8x128xf32>
      %106 = vector.shape_cast %105 : vector<1x8x128xf32> to vector<8x128xf32>
      %cst_91 = arith.constant dense<0.000000e+00> : vector<8x128xf32>
      %107 = tpu.matmul %104, %106, %cst_91 {dimension_numbers = #tpu.dot_dimension_numbers<[1], [0], [0], [1], [0, 0, 1, 1], [], []>} : vector<8x8xf32>, vector<8x128xf32>, vector<8x128xf32> -> vector<8x128xf32>
      %108 = vector.extract_strided_slice %102 {offsets = [1, 0, 0], sizes = [1, 8, 8], strides = [1, 1, 1]} : vector<4x8x8xf32> to vector<1x8x8xf32>
      %109 = vector.shape_cast %108 : vector<1x8x8xf32> to vector<8x8xf32>
      %c1_92 = arith.constant 1 : index
      %c0_93 = arith.constant 0 : index
      %c0_94 = arith.constant 0 : index
      %110 = vector.load %arg8[%c1_92, %c0_93, %c0_94] : memref<4x8x128xf32, #tpu.memory_space<vmem>>, vector<1x8x128xf32>
      %111 = vector.shape_cast %110 : vector<1x8x128xf32> to vector<8x128xf32>
      %cst_95 = arith.constant dense<0.000000e+00> : vector<8x128xf32>
      %112 = tpu.matmul %109, %111, %cst_95 {dimension_numbers = #tpu.dot_dimension_numbers<[1], [0], [0], [1], [0, 0, 1, 1], [], []>} : vector<8x8xf32>, vector<8x128xf32>, vector<8x128xf32> -> vector<8x128xf32>
      %113 = arith.addf %107, %112 : vector<8x128xf32>
      %114 = vector.extract_strided_slice %102 {offsets = [2, 0, 0], sizes = [1, 8, 8], strides = [1, 1, 1]} : vector<4x8x8xf32> to vector<1x8x8xf32>
      %115 = vector.shape_cast %114 : vector<1x8x8xf32> to vector<8x8xf32>
      %c2_96 = arith.constant 2 : index
      %c0_97 = arith.constant 0 : index
      %c0_98 = arith.constant 0 : index
      %116 = vector.load %arg8[%c2_96, %c0_97, %c0_98] : memref<4x8x128xf32, #tpu.memory_space<vmem>>, vector<1x8x128xf32>
      %117 = vector.shape_cast %116 : vector<1x8x128xf32> to vector<8x128xf32>
      %cst_99 = arith.constant dense<0.000000e+00> : vector<8x128xf32>
      %118 = tpu.matmul %115, %117, %cst_99 {dimension_numbers = #tpu.dot_dimension_numbers<[1], [0], [0], [1], [0, 0, 1, 1], [], []>} : vector<8x8xf32>, vector<8x128xf32>, vector<8x128xf32> -> vector<8x128xf32>
      %119 = arith.addf %113, %118 : vector<8x128xf32>
      %120 = vector.extract_strided_slice %102 {offsets = [3, 0, 0], sizes = [1, 8, 8], strides = [1, 1, 1]} : vector<4x8x8xf32> to vector<1x8x8xf32>
      %121 = vector.shape_cast %120 : vector<1x8x8xf32> to vector<8x8xf32>
      %c3_100 = arith.constant 3 : index
      %c0_101 = arith.constant 0 : index
      %c0_102 = arith.constant 0 : index
      %122 = vector.load %arg8[%c3_100, %c0_101, %c0_102] : memref<4x8x128xf32, #tpu.memory_space<vmem>>, vector<1x8x128xf32>
      %123 = vector.shape_cast %122 : vector<1x8x128xf32> to vector<8x128xf32>
      %cst_103 = arith.constant dense<0.000000e+00> : vector<8x128xf32>
      %124 = tpu.matmul %121, %123, %cst_103 {dimension_numbers = #tpu.dot_dimension_numbers<[1], [0], [0], [1], [0, 0, 1, 1], [], []>} : vector<8x8xf32>, vector<8x128xf32>, vector<8x128xf32> -> vector<8x128xf32>
      %125 = arith.addf %119, %124 : vector<8x128xf32>
      %c0_104 = arith.constant 0 : index
      %c0_105 = arith.constant 0 : index
      %126 = vector.load %arg12[%c0_104, %c0_105] : memref<1x128xf32, #tpu.memory_space<vmem>>, vector<1x128xf32>
      %127 = vector.broadcast %126 : vector<1x128xf32> to vector<8x128xf32>
      %128 = arith.addf %125, %127 : vector<8x128xf32>
      %c0_106 = arith.constant 0 : index
      %c0_107 = arith.constant 0 : index
      %c0_108 = arith.constant 0 : index
      %129 = vector.load %arg13[%c0_106, %c0_107, %c0_108] : memref<1x8x128xf32, #tpu.memory_space<vmem>>, vector<1x8x128xf32>
      %130 = vector.shape_cast %129 : vector<1x8x128xf32> to vector<8x128xf32>
      %131 = vector.shape_cast %128 : vector<8x128xf32> to vector<1x8x128xf32>
      tpu.vector_store %arg13[%c0_106, %c0_107, %c0_108], %131 {strides = array<i32>} : memref<1x8x128xf32, #tpu.memory_space<vmem>>, vector<1x8x128xf32>,
    } else {
    }
    return
  }
  func.func @transform_0(%arg0: i32, %arg1: i32, %arg2: i32) -> (i32, i32, i32) {
    %c0_i32 = arith.constant 0 : i32
    %c0_i32_0 = arith.constant 0 : i32
    return %arg0, %arg1, %c0_i32 : i32, i32, i32
  }
  func.func @transform_1(%arg0: i32, %arg1: i32, %arg2: i32) -> (i32, i32, i32) {
    %c0_i32 = arith.constant 0 : i32
    %c0_i32_0 = arith.constant 0 : i32
    return %arg0, %arg2, %c0_i32 : i32, i32, i32
  }
  func.func @transform_2(%arg0: i32, %arg1: i32, %arg2: i32) -> (i32, i32, i32) {
    %c0_i32 = arith.constant 0 : i32
    %c0_i32_0 = arith.constant 0 : i32
    %c0_i32_1 = arith.constant 0 : i32
    %c0_i32_2 = arith.constant 0 : i32
    return %c0_i32, %c0_i32_0, %c0_i32_1 : i32, i32, i32
  }
  func.func @transform_3(%arg0: i32, %arg1: i32, %arg2: i32) -> (i32, i32, i32) {
    %c0_i32 = arith.constant 0 : i32
    %c0_i32_0 = arith.constant 0 : i32
    %c0_i32_1 = arith.constant 0 : i32
    %c0_i32_2 = arith.constant 0 : i32
    return %c0_i32, %c0_i32_0, %c0_i32_1 : i32, i32, i32
  }
  func.func @transform_4(%arg0: i32, %arg1: i32, %arg2: i32) -> (i32, i32, i32) {
    %c0_i32 = arith.constant 0 : i32
    %c0_i32_0 = arith.constant 0 : i32
    %c0_i32_1 = arith.constant 0 : i32
    %c0_i32_2 = arith.constant 0 : i32
    return %c0_i32, %c0_i32_0, %c0_i32_1 : i32, i32, i32
  }
  func.func @transform_5(%arg0: i32, %arg1: i32, %arg2: i32) -> (i32, i32, i32) {
    %c0_i32 = arith.constant 0 : i32
    %c0_i32_0 = arith.constant 0 : i32
    %c0_i32_1 = arith.constant 0 : i32
    %c0_i32_2 = arith.constant 0 : i32
    return %c0_i32, %c0_i32_0, %c0_i32_1 : i32, i32, i32
  }
  func.func @transform_6(%arg0: i32, %arg1: i32, %arg2: i32) -> (i32, i32, i32) {
    %c0_i32 = arith.constant 0 : i32
    %c0_i32_0 = arith.constant 0 : i32
    %c0_i32_1 = arith.constant 0 : i32
    %c0_i32_2 = arith.constant 0 : i32
    return %c0_i32, %c0_i32_0, %c0_i32_1 : i32, i32, i32
  }
  func.func @transform_7(%arg0: i32, %arg1: i32, %arg2: i32) -> (i32, i32, i32) {
    %c0_i32 = arith.constant 0 : i32
    %c0_i32_0 = arith.constant 0 : i32
    %c0_i32_1 = arith.constant 0 : i32
    %c0_i32_2 = arith.constant 0 : i32
    return %c0_i32, %c0_i32_0, %c0_i32_1 : i32, i32, i32
  }
  func.func @transform_8(%arg0: i32, %arg1: i32, %arg2: i32) -> (i32, i32, i32) {
    %c0_i32 = arith.constant 0 : i32
    %c0_i32_0 = arith.constant 0 : i32
    %c0_i32_1 = arith.constant 0 : i32
    %c0_i32_2 = arith.constant 0 : i32
    return %c0_i32, %c0_i32_0, %c0_i32_1 : i32, i32, i32
  }
  func.func @transform_9(%arg0: i32, %arg1: i32, %arg2: i32) -> (i32, i32) {
    %c0_i32 = arith.constant 0 : i32
    %c0_i32_0 = arith.constant 0 : i32
    %c0_i32_1 = arith.constant 0 : i32
    return %c0_i32, %c0_i32_0 : i32, i32
  }
  func.func @transform_10(%arg0: i32, %arg1: i32, %arg2: i32) -> (i32, i32, i32) {
    %c0_i32 = arith.constant 0 : i32
    %c0_i32_0 = arith.constant 0 : i32
    return %arg0, %arg1, %c0_i32 : i32, i32, i32
  }
}

</mosaic_0001>

<bundles_post_ra>
// kernel: tpu_custom_call.1
= control target key start
LH: loop header
LB: loop body
LE: loop exit
PB: predicated region body
PF: predicated region fallthrough
CT: control target
= control target key end

     0   :  { %15 = vsyncpa [#allocation7], 0  ;;  %s2144_s0 = inlined_call_operand.vmem [shape: f32[2,8,32], index: 0, kind: input, shape index: {}]   ;;  %s2145_s1 = inlined_call_operand.vmem [shape: f32[2,8,32], index: 1, kind: input, shape index: {}]   ;;  %s2146_s2 = inlined_call_operand.vmem [shape: f32[4,32,8], index: 2, kind: input, shape index: {}]   ;;  %s2147_s3 = inlined_call_operand.vmem [shape: f32[4,32,8], index: 3, kind: input, shape index: {}]   ;;  %s2148_s4 = inlined_call_operand.vmem [shape: f32[4,32,8], index: 4, kind: input, shape index: {}]   ;;  %s2149_s5 = inlined_call_operand.vmem [shape: f32[4,8,128], index: 5, kind: input, shape index: {}]   ;;  %s2150_s6 = inlined_call_operand.vmem [shape: f32[4,1,8], index: 6, kind: input, shape index: {}]   ;;  %s2151_s7 = inlined_call_operand.vmem [shape: f32[4,1,8], index: 7, kind: input, shape index: {}]   ;;  %s2152_s8 = inlined_call_operand.vmem [shape: f32[4,1,8], index: 8, kind: input, shape index: {}]   ;;  %s2153_s9 = inlined_call_operand.vmem [shape: f32[1,128], index: 9, kind: input, shape index: {}]   ;;  %s2154_s10 = inlined_call_operand.hbm [shape: f32[2,8,128], index: 10, kind: output, shape index: {}]  }
   0x1   :  { %17 = vsyncpa [#allocation7 + $0x1], 0  ;;  %s1770_s13 = smov 0   ;;  %s1772_s14 = smov 0  }
   0x2   :  { %s1774_s15 = smov 0   ;;  %s1776_s16 = smov 0  }
   0x3   :  { %s1778_s17 = smov 0   ;;  %s1780_s18 = smov 0  }
   0x4 LB: > { %2157 = sst [smem:[#allocation9_spill]] %s1706_s17  ;;  %s1446_s19 = sadd.s32 4294967295, %s1710_s18   ;;  %s1710_s18 = sphi %s1780_s18, %s23_s18   ;;  %s1706_s17 = sphi %s1778_s17, %s2162_s17   ;;  %s1702_s16 = sphi %s1776_s16, %s2161_s16   ;;  %s1698_s15 = sphi %s1774_s15, %s2165_s15   ;;  %s1694_s14 = sphi %s1772_s14, %s2164_s14   ;;  %s1690_s13 = sphi %s1770_s13, %s2163_s13  }
   0x5   : > { %s1447_s20 = sadd.s32 4294967294, %s1710_s18   ;;  %s42_s21 = sadd.s32 1, %s1706_s17 }
   0x6   : > { %s275_s22 = sadd.s32 1, %s1698_s15  ;;  %p44_p0 = scmp.ge.s32.totalorder %s42_s21, 2 }
   0x7   : > { %p285_p1 = scmp.ne.s32.totalorder %s1698_s15, %s1694_s14  ;;  %p286_p2 = scmp.eq.s32.totalorder %s1446_s19, 1 }
   0x8   : > { %p291_p3 = scmp.ne.s32.totalorder %s1694_s14, %s1690_s13  ;;  %s2167_s21 = smov (%p44_p0, %s42_s21), 0 }
   0x9   : > { %2158 = sst [smem:[#allocation10_spill]] %s2167_s21  ;;  %p1810_p4 = por %p286_p2, %p285_p1 }
   0xa   : > { %p292_p5 = scmp.eq.s32.totalorder %s1447_s20, 1  ;;  %s270_s24 = ssub.s32 %s1706_s17, %s2167_s21 }
   0xb   : > { %p1450_p6 = scmp.ge.s32.totalorder %s1710_s18, 1  ;;  %p273_p7 = scmp.eq.s32.totalorder %s270_s24, 0 }
   0xc   : > { %p1817_p8 = por %p292_p5, %p291_p3  ;;  %p354_p9 = scmp.lt.s32.totalorder %s1710_s18, 3 }
   0xd   : > { %s1823_s26 = scalar_select %p273_p7, %s1698_s15, %s275_s22  }
   0xe   : > { %p355_p10 = pnand %p1450_p6, %p354_p9 }
   0xf   : > { %p401_p11 = scmp.lt.s32.totalorder (!%p355_p10), %s1702_s16, 1  ;;  %s398_s20 = sand.u32 (!%p355_p10), 1, %s1694_s14  }
  0x10   : > { %358 = sbr.rel (%p355_p10) target bundleno = 937 (0x3a9), region = 60  ;;  %s1451_s22 = sshll.u32 (!%p355_p10), %s398_s20, 3 }
  0x11   : > { %s1531_s24 = sshll.u32 (!%p355_p10), %s1702_s16, 3  ;;  %s400_s11 = scalar_lea.vmem (!%p355_p10), [#allocation6], %s1451_s22 }
  0x12   : > { %s1352_s28 = scalar_lea.hbm (!%p355_p10), %s2154_s10, %s1531_s24 }
  0x13   : > { %s1356_s17 = sshll.u32 (!%p355_p10), %s1352_s28, 4  ;;  %s1357_s17 = int_to_ptr.hbm [resolvable:$true] %s1356_s17 }
  0x14   : > { %s1646_s12 = sshra.s32 (!%p355_p10), %s1357_s17, 4  ;;  %s1647_s12 = int_to_ptr.hbm [resolvable:$true] %s1646_s12 }
  0x15   : > { %v423_v0 = vld [vmem:[%s2146_s2 + $0x18] sm:$0xff]  ;;  %v422_v1 = vld [vmem:[%s2146_s2 + $0x10] sm:$0xff]  ;;  %v421_v4 = vld [vmem:[%s2146_s2 + $0x8] sm:$0xff]  ;;  %s402_s29 = scalar_select %p401_p11, %s1702_s16, 1  ;;  %vm428_vm0 = vcmask 261120   ;;  %vm453_vm1 = vcmask 64512  }
  0x16   : > { %v1464_v2 = vld [vmem:[%s2146_s2 + $0x58] sm:$0xff]  ;;  %444 = vmatpush.msra.mxu0 %v423_v0  ;;  %v1463_v3 = vld [vmem:[%s2146_s2 + $0x50] sm:$0xff]  ;;  %v1462_v5 = vld [vmem:[%s2146_s2 + $0x48] sm:$0xff]  ;;  %vm554_vm2 = vcmask 7168   ;;  %s1341_s16 = scalar_lea.sflag [#allocation7], %s398_s20  ;;  %s1648_s24 = scalar_lea.hbm %s1647_s12, 8 }
  0x17   : > { %510 = vmatpush.msra.mxu2 %v1464_v2  ;;  %v420_v6 = vld [vmem:[%s2146_s2] sm:$0xff]  ;;  %v1458_v7 = vld [vmem:[%s2146_s2 + $0x38] sm:$0xff]  ;;  %s1452_s19 = sshll.u32 %s402_s29, 3  ;;  %v1457_v9 = vld [vmem:[%s2146_s2 + $0x30] sm:$0xff]  ;;  %s1354_s29 = sshll.u32 %s400_s11, 4  ;;  %s1355_s29 = int_to_ptr.vmem [resolvable:$true] %s1354_s29 }
  0x18   : > { %445 = vmatpush.msra.mxu0 %v422_v1  ;;  %v1461_v8 = vld [vmem:[%s2146_s2 + $0x40] sm:$0xff]  ;;  %477 = vmatpush.msra.mxu1 %v1458_v7  ;;  %v1470_v10 = vld [vmem:[%s2146_s2 + $0x78] sm:$0xff]  ;;  %s407_s21 = scalar_lea.vmem %s2144_s0, %s1452_s19  ;;  %v1456_v14 = vld [vmem:[%s2146_s2 + $0x28] sm:$0xff]  ;;  %p1649_p12 = scmp.ne.s32.totalorder %s1647_s12, %s1648_s24 }
  0x19   : > { %511 = vmatpush.msra.mxu2 %v1463_v3  ;;  %v419_v11 = vld [vmem:[%s407_s21] sm:$0xff]  ;;  %v571_v12 = vld [vmem:[%s2147_s3 + $0x18] sm:$0xff]  ;;  %543 = vmatpush.msra.mxu3 %v1470_v10  ;;  %v1469_v15 = vld [vmem:[%s2146_s2 + $0x70] sm:$0xff]  ;;  %s414_s21 = scalar_lea.vmem %s2145_s1, %s1452_s19  ;;  %p1653_p1 = scmp.lt.s32.totalorder %s1647_s12, %s2154_s10 }
  0x1a   : > { %446 = vmatpush.msra.mxu0 %v421_v4  ;;  %v1478_v13 = vld [vmem:[%s2147_s3 + $0x38] sm:$0xff]  ;;  %478 = vmatpush.msra.mxu1 %v1457_v9  ;;  %v570_v16 = vld [vmem:[%s2147_s3 + $0x10] sm:$0xff]  ;;  %v1455_v18 = vld [vmem:[%s2146_s2 + $0x20] sm:$0xff]  ;;  %p1650_p13 = pnand %p1649_p12, %p1810_p4 }
  0x1b   : > { %512 = vmatpush.msra.mxu2 %v1462_v5  ;;  %v1477_v17 = vld [vmem:[%s2147_s3 + $0x30] sm:$0xff]  ;;  %v1468_v19 = vld [vmem:[%s2146_s2 + $0x68] sm:$0xff]  ;;  %544 = vmatpush.msra.mxu3 %v1469_v15  ;;  %v568_v21 = vld [vmem:[%s2147_s3] sm:$0xff] }
  0x1c   : > { %447 = vmatpush.msra.mxu0 %v420_v6  ;;  %v569_v20 = vld [vmem:[%s2147_s3 + $0x8] sm:$0xff]  ;;  %479 = vmatpush.msra.mxu1 %v1456_v14  ;;  %v1901_v23 = vld [vmem:[%s414_s21] sm:$0xff]  ;;  %v1490_v26 = vld [vmem:[%s2147_s3 + $0x58] sm:$0xff]  ;;  %p1651_p0 = pneg %p1650_p13  ;;  %s1652_s21 = scalar_lea.hbm %s2154_s10, 16 }
  0x1d   : > { %513 = vmatpush.msra.mxu2 %v1461_v8  ;;  %1454 = vmatmul.msk.f32.vlgmr.msra.gmra.mxu0 %vm428_vm0, %v419_v11  ;;  %v1476_v22 = vld [vmem:[%s2147_s3 + $0x28] sm:$0xff]  ;;  %v1475_v24 = vld [vmem:[%s2147_s3 + $0x20] sm:$0xff]  ;;  %v1502_v27 = vld [vmem:[%s2147_s3 + $0x78] sm:$0xff]  ;;  %p1654_p2 = scmp.lt.s32.totalorder %s1652_s21, %s1648_s24 }
  0x1e   : > { %1466 = vmatmul.msk.f32.vlgmr.msra.gmra.mxu2 %vm428_vm0, %v419_v11  ;;  %592 = vmatpush.msrb.mxu0 %v571_v12  ;;  %v1467_v25 = vld [vmem:[%s2146_s2 + $0x60] sm:$0xff]  ;;  %v603_v28 = vld [vmem:[%s2148_s4 + $0x18] sm:$0xff]  ;;  %v1489_v29 = vld [vmem:[%s2147_s3 + $0x50] sm:$0xff] }
  0x1f   : > { %650 = vmatpush.msrb.mxu2 %v1478_v13  ;;  %480 = vmatpush.msra.mxu1 %v1455_v18  ;;  %v1501_v30 = vld [vmem:[%s2147_s3 + $0x70] sm:$0xff]  ;;  %v1488_v31 = vld [vmem:[%s2147_s3 + $0x48] sm:$0xff]  ;;  %v1487_v33 = vld [vmem:[%s2147_s3 + $0x40] sm:$0xff]  ;;  %p1655_p3 = por %p1654_p2, %p1653_p1 }
  0x20   : > { %593 = vmatpush.msrb.mxu0 %v570_v16  ;;  %545 = vmatpush.msra.mxu3 %v1468_v19  ;;  %v1500_v32 = vld [vmem:[%s2147_s3 + $0x68] sm:$0xff]  ;;  %v1499_v34 = vld [vmem:[%s2147_s3 + $0x60] sm:$0xff]  ;;  %v602_v35 = vld [vmem:[%s2148_s4 + $0x10] sm:$0xff] }
  0x21   : > { %651 = vmatpush.msrb.mxu2 %v1477_v17  ;;  %1460 = vmatmul.msk.f32.vlgmr.msra.gmra.mxu1 %vm428_vm0, %v419_v11  ;;  %v601_v36 = vld [vmem:[%s2148_s4 + $0x8] sm:$0xff]  ;;  %v600_v37 = vld [vmem:[%s2148_s4] sm:$0xff]  ;;  %v1484_v38 = vld [vmem:[%s2148_s4 + $0x38] sm:$0xff]  ;;  %p1656_p5 = pnand %p1655_p3, %p1651_p0 }
  0x22   : > { %594 = vmatpush.msrb.mxu0 %v569_v20  ;;  %546 = vmatpush.msra.mxu3 %v1467_v25  ;;  %v1496_v39 = vld [vmem:[%s2148_s4 + $0x58] sm:$0xff]  ;;  %v1483_v40 = vld [vmem:[%s2148_s4 + $0x30] sm:$0xff]  ;;  %v1482_v42 = vld [vmem:[%s2148_s4 + $0x28] sm:$0xff] }
  0x23   : > { %652 = vmatpush.msrb.mxu2 %v1476_v22  ;;  %1472 = vmatmul.msk.f32.vlgmr.msra.gmra.mxu3 %vm428_vm0, %v419_v11  ;;  %v1495_v41 = vld [vmem:[%s2148_s4 + $0x50] sm:$0xff]  ;;  %v1494_v43 = vld [vmem:[%s2148_s4 + $0x48] sm:$0xff]  ;;  %v1481_v44 = vld [vmem:[%s2148_s4 + $0x20] sm:$0xff] }
  0x24   : > { %595 = vmatpush.msrb.mxu0 %v568_v21  ;;  %620 = vmatpush.msrb.mxu1 %v603_v28  ;;  %v1493_v45 = vld [vmem:[%s2148_s4 + $0x40] sm:$0xff]  ;;  %v1508_v46 = vld [vmem:[%s2148_s4 + $0x78] sm:$0xff]  ;;  %v1507_v47 = vld [vmem:[%s2148_s4 + $0x70] sm:$0xff] }
  0x25   : > { %653 = vmatpush.msrb.mxu2 %v1475_v24  ;;  %1473 = vmatmul.msk.f32.vlgmr.msrb.gmra.mxu0 %vm428_vm0, %v1901_v23  ;;  %v1506_v48 = vld [vmem:[%s2148_s4 + $0x68] sm:$0xff]  ;;  %v1505_v49 = vld [vmem:[%s2148_s4 + $0x60] sm:$0xff] }
  0x26   : > { %1480 = vmatmul.msk.f32.vlgmr.msrb.gmra.mxu2 %vm428_vm0, %v1901_v23  ;;  %710 = vmatpush.msra.mxu0 %v1490_v26  ;;  %v1595_v50 = vld [vmem:[%s2150_s6] ss:$0 sm:$0xff]  ;;  %v1596_v54 = vld [vmem:[%s2150_s6 + $0x2] ss:$0 sm:$0xff]  ;;  %v1598_v55 = vld [vmem:[%s2150_s6 + $0x1] ss:$0 sm:$0xff] }
  0x27   : > { %770 = vmatpush.msra.mxu2 %v1502_v27  ;;  %621 = vmatpush.msrb.mxu1 %v602_v35  ;;  %v1597_v56 = vld [vmem:[%s2151_s7] ss:$0 sm:$0xff]  ;;  %v1599_v1 = vld [vmem:[%s2151_s7 + $0x1] ss:$0 sm:$0xff]  ;;  %v1601_v3 = vld [vmem:[%s2150_s6 + $0x3] ss:$0 sm:$0xff] }
  0x28   : > { %711 = vmatpush.msra.mxu0 %v1489_v29  ;;  %680 = vmatpush.msrb.mxu3 %v1484_v38  ;;  %v1600_v4 = vld [vmem:[%s2151_s7 + $0x2] ss:$0 sm:$0xff]  ;;  %v1602_v14 = vld [vmem:[%s2151_s7 + $0x3] ss:$0 sm:$0xff]  ;;  %v1603_v18 = vld [vmem:[%s2152_s8] ss:$0 sm:$0xff] }
  0x29   : > { %771 = vmatpush.msra.mxu2 %v1501_v30  ;;  %622 = vmatpush.msrb.mxu1 %v601_v36  ;;  %v1604_v21 = vld [vmem:[%s2152_s8 + $0x2] ss:$0 sm:$0xff]  ;;  %v1605_v24 = vld [vmem:[%s2152_s8 + $0x1] ss:$0 sm:$0xff]  ;;  %v1606_v27 = vld [vmem:[%s2152_s8 + $0x3] ss:$0 sm:$0xff] }
  0x2a   : > { %712 = vmatpush.msra.mxu0 %v1488_v31  ;;  %681 = vmatpush.msrb.mxu3 %v1483_v40  ;;  %v1712_v30 = vmov -inf   ;;  %v1714_v40 = vmov 0.0  }
  0x2b   : > { %772 = vmatpush.msra.mxu2 %v1500_v32  ;;  %623 = vmatpush.msrb.mxu1 %v600_v37  ;;  %555 = vst.msk [vmem:[#allocation3] sm:$0xff] %vm554_vm2, %v1712_v30 }
  0x2c   : > { %713 = vmatpush.msra.mxu0 %v1487_v33  ;;  %1474 = vmatmul.msk.f32.vlgmr.msrb.gmra.mxu1 %vm428_vm0, %v1901_v23  ;;  %556 = vst.msk [vmem:[#allocation3 + $0x8] sm:$0xff] %vm554_vm2, %v1712_v30 }
  0x2d   : > { %1492 = vmatmul.msk.f32.vlgmr.msra.gmra.mxu0 %vm428_vm0, %v1901_v23  ;;  %773 = vmatpush.msra.mxu2 %v1499_v34  ;;  %557 = vst.msk [vmem:[#allocation3 + $0x10] sm:$0xff] %vm554_vm2, %v1712_v30 }
  0x2e   : > { %1504 = vmatmul.msk.f32.vlgmr.msra.gmra.mxu2 %vm428_vm0, %v1901_v23  ;;  %740 = vmatpush.msra.mxu1 %v1496_v39  ;;  %558 = vst.msk [vmem:[#allocation3 + $0x18] sm:$0xff] %vm554_vm2, %v1712_v30  ;;  %v1713_v39 = vmov 0  }
  0x2f   : > { %682 = vmatpush.msrb.mxu3 %v1482_v42  ;;  %1593 = vset.pattern.permute.xlu0 %v1713_v39  ;;  %561 = vst.msk [vmem:[#allocation4 + $0x10] sm:$0xff] %vm554_vm2, %v1714_v40 }
  0x30   : > { %741 = vmatpush.msra.mxu1 %v1495_v41  ;;  %1594 = vset.pattern.permute.xlu1 %v1713_v39  ;;  %559 = vst.msk [vmem:[#allocation4] sm:$0xff] %vm554_vm2, %v1714_v40 }
  0x31   : > { %683 = vmatpush.msrb.mxu3 %v1481_v44  ;;  %1592 = vset.pattern.permute.xlu2 %v1713_v39  ;;  %560 = vst.msk [vmem:[#allocation4 + $0x8] sm:$0xff] %vm554_vm2, %v1714_v40 }
  0x32   : > { %742 = vmatpush.msra.mxu1 %v1494_v43  ;;  %1486 = vmatmul.msk.f32.vlgmr.msrb.gmra.mxu3 %vm428_vm0, %v1901_v23  ;;  %562 = vst.msk [vmem:[#allocation4 + $0x18] sm:$0xff] %vm554_vm2, %v1714_v40  ;;  %v917_v41 = vld [vmem:[#allocation3] sm:$0xff] }
  0x33   : > { %800 = vmatpush.msra.mxu3 %v1508_v46  ;;  %563 = vst.msk [vmem:[#allocation5] sm:$0xff] %vm453_vm1, %v1714_v40 }
  0x34   : > { %743 = vmatpush.msra.mxu1 %v1493_v45  ;;  %564 = vst.msk [vmem:[#allocation5 + $0x8] sm:$0xff] %vm453_vm1, %v1714_v40  ;;  %v918_v45 = vld [vmem:[#allocation3 + $0x8] sm:$0xff] }
  0x35   : > { %1498 = vmatmul.msk.f32.vlgmr.msra.gmra.mxu1 %vm428_vm0, %v1901_v23  ;;  %801 = vmatpush.msra.mxu3 %v1507_v47  ;;  %565 = vst.msk [vmem:[#allocation5 + $0x10] sm:$0xff] %vm453_vm1, %v1714_v40 }
  0x36   : > { %566 = vst.msk [vmem:[#allocation5 + $0x18] sm:$0xff] %vm453_vm1, %v1714_v40 }
  0x37   : > { %802 = vmatpush.msra.mxu3 %v1506_v48 }
  0x39   : > { %803 = vmatpush.msra.mxu3 %v1505_v49  ;;  %v919_v49 = vld [vmem:[#allocation3 + $0x10] sm:$0xff] }
  0x3a   : > { %1510 = vmatmul.msk.f32.vlgmr.msra.gmra.mxu3 %vm428_vm0, %v1901_v23 }
  0x9a   : > { %v449_v51 = vpop.f32.mrf.mxu0 }
  0x9b   : > { %v450_v52 = vadd.f32 %v1595_v50, %v449_v51 }
  0x9d   : > { %v452_v53 = vmul.f32 0.35355338, %v450_v52 }
  0x9e   : > { %v482_v58 = vpop.f32.mrf.mxu1 }
  0x9f   : > { %454 = vst.msk [vmem:[#allocation2] sm:$0xff] %vm453_vm1, %v452_v53  ;;  %v483_v60 = vadd.f32 %v1598_v55, %v482_v58  ;;  %v920_v53 = vld [vmem:[#allocation3 + $0x18] sm:$0xff] }
  0xa1   : > { %v515_v57 = vpop.f32.mrf.mxu2  ;;  %v485_v0 = vmul.f32 0.35355338, %v483_v60 }
  0xa2   : > { %v516_v59 = vadd.f32 %v1596_v54, %v515_v57  ;;  %v597_v61 = vpop.f32.mrf.mxu0 }
  0xa3   : > { %v598_v63 = vadd.f32 %v1597_v56, %v597_v61  ;;  %487 = vst.msk [vmem:[#allocation2 + $0x8] sm:$0xff] %vm453_vm1, %v485_v0 }
  0xa4   : > { %v518_v62 = vmul.f32 0.35355338, %v516_v59 }
  0xa5   : > { %1511 = vmatpush.xpose.msk.msrb.mxu0 %vm453_vm1, %v598_v63 }
  0xa6   : > { %520 = vst.msk [vmem:[#allocation2 + $0x10] sm:$0xff] %vm453_vm1, %v518_v62  ;;  %v808_v2 = vld [vmem:[#allocation2] sm:$0xff]  ;;  %v548_v7 = vpop.f32.mrf.mxu3 }
  0xa7   : > { %v549_v9 = vadd.f32 %v1601_v3, %v548_v7 }
  0xa8   : > { %1512 = vmatmul.msk.f32.vlgmr.msrb.gmra.mxu0 %vm453_vm1, %v808_v2 }
  0xa9   : > { %v655_v5 = vpop.f32.mrf.mxu2  ;;  %v551_v11 = vmul.f32 0.35355338, %v549_v9  ;;  %v625_v19 = vpop.f32.mrf.mxu1 }
  0xaa   : > { %v656_v6 = vadd.f32 %v1599_v1, %v655_v5  ;;  %v715_v8 = vpop.f32.mrf.mxu0  ;;  %v809_v12 = vld [vmem:[#allocation2 + $0x8] sm:$0xff]  ;;  %v626_v20 = vadd.f32 %v1603_v18, %v625_v19 }
  0xab   : > { %v716_v10 = vadd.f32 %v1600_v4, %v715_v8  ;;  %553 = vst.msk [vmem:[#allocation2 + $0x18] sm:$0xff] %vm453_vm1, %v551_v11 }
  0xac   : > { %1513 = vmatpush.xpose.msk.msrb.mxu1 %vm453_vm1, %v656_v6  ;;  %1056 = vmatpush.msra.mxu0 %v626_v20 }
  0xad   : > { %1515 = vmatpush.xpose.msk.msrb.mxu2 %vm453_vm1, %v716_v10  ;;  %v810_v13 = vld [vmem:[#allocation2 + $0x10] sm:$0xff] }
  0xaf   : > { %1514 = vmatmul.msk.f32.vlgmr.msrb.gmra.mxu1 %vm453_vm1, %v809_v12 }
  0xb0   : > { %1516 = vmatmul.msk.f32.vlgmr.msrb.gmra.mxu2 %vm453_vm1, %v810_v13 }
  0xb1   : > { %v775_v15 = vpop.f32.mrf.mxu2 }
  0xb2   : > { %v776_v16 = vadd.f32 %v1602_v14, %v775_v15  ;;  %v811_v17 = vld [vmem:[#allocation2 + $0x18] sm:$0xff]  ;;  %v745_v22 = vpop.f32.mrf.mxu1 }
  0xb3   : > { %v746_v23 = vadd.f32 %v1604_v21, %v745_v22  ;;  %v983_v21 = vld [vmem:[#allocation4 + $0x10] sm:$0xff] }
  0xb4   : > { %1517 = vmatpush.xpose.msk.msrb.mxu3 %vm453_vm1, %v776_v16 }
  0xb5   : > { %1102 = vmatpush.msra.mxu2 %v746_v23  ;;  %v685_v25 = vpop.f32.mrf.mxu3 }
  0xb6   : > { %v686_v26 = vadd.f32 %v1605_v24, %v685_v25  ;;  %v984_v25 = vld [vmem:[#allocation4 + $0x18] sm:$0xff] }
  0xb7   : > { %1518 = vmatmul.msk.f32.vlgmr.msrb.gmra.mxu3 %vm453_vm1, %v811_v17 }
  0xb8   : > { %1079 = vmatpush.msra.mxu1 %v686_v26  ;;  %v981_v26 = vld [vmem:[#allocation4] sm:$0xff] }
  0xbd   : > { %v805_v28 = vpop.f32.mrf.mxu3 }
  0xbe   : > { %v806_v29 = vadd.f32 %v1606_v27, %v805_v28 }
  0xc0   : > { %1125 = vmatpush.msra.mxu3 %v806_v29 }
 0x125   : > { %v836_v31 = vpop.f32.mrf.mxu0 }
 0x126   : > { %v921_v32 = vsel %vm453_vm1, %v836_v31, -inf }
 0x127   : > { %922 = vmax.xlane.f32.xlu1 %v921_v32 }
 0x12c   : > { %v2052_v33 = vpop.f32.mrf.mxu1 }
 0x12d   : > { %v924_v34 = vsel %vm453_vm1, %v2052_v33, -inf }
 0x12f   : > { %925 = vmax.xlane.f32.xlu1 %v924_v34  ;;  %v982_v34 = vld [vmem:[#allocation4 + $0x8] sm:$0xff] }
 0x133   : > { %v888_v35 = vpop.f32.mrf.mxu2 }
 0x134   : > { %v927_v36 = vsel %vm453_vm1, %v888_v35, -inf }
 0x135   : > { %928 = vmax.xlane.f32.xlu0 %v927_v36 }
 0x13a   : > { %v914_v37 = vpop.f32.mrf.mxu3 }
 0x13b   : > { %v930_v38 = vsel %vm453_vm1, %v914_v37, -inf }
 0x13d   : > { %931 = vmax.xlane.f32.xlu0 %v930_v38 }
 0x19a   : > { %v923_v42 = vpop.xlane.xlu1 %922 }
 0x19b   : > { %v933_v43 = vmax.f32 %v917_v41, %v923_v42 }
 0x19d   : > { %v937_v44 = vsub.f32 %v917_v41, %v933_v43  ;;  %1138 = vst.msk [vmem:[#allocation3] sm:$0xff] %vm554_vm2, %v933_v43  ;;  %951 = vperm.xlu0 %1593, %v933_v43  }
 0x19f   : > { %v941_v16 = vmul.f32 1.442695, %v937_v44 }
 0x1a2   : > { %v926_v46 = vpop.xlane.xlu1 %925 }
 0x1a3   : > { %v934_v47 = vmax.f32 %v918_v45, %v926_v46  ;;  %v1012_v46 = vld [vmem:[#allocation5 + $0x10] sm:$0xff] }
 0x1a5   : > { %v938_v48 = vsub.f32 %v918_v45, %v934_v47  ;;  %1139 = vst.msk [vmem:[#allocation3 + $0x8] sm:$0xff] %vm554_vm2, %v934_v47  ;;  %956 = vperm.xlu1 %1594, %v934_v47  }
 0x1a7   : > { %v943_v18 = vmul.f32 1.442695, %v938_v48 }
 0x1a8   : > { %v929_v50 = vpop.xlane.xlu0 %928 }
 0x1a9   : > { %v935_v51 = vmax.f32 %v919_v49, %v929_v50 }
 0x1ab   : > { %v939_v52 = vsub.f32 %v919_v49, %v935_v51  ;;  %1140 = vst.msk [vmem:[#allocation3 + $0x10] sm:$0xff] %vm554_vm2, %v935_v51  ;;  %961 = vperm.xlu2 %1592, %v935_v51  }
 0x1ad   : > { %v945_v14 = vmul.f32 1.442695, %v939_v52 }
 0x1b0   : > { %v932_v54 = vpop.xlane.xlu0 %931 }
 0x1b1   : > { %v936_v55 = vmax.f32 %v920_v53, %v932_v54 }
 0x1b3   : > { %v940_v56 = vsub.f32 %v920_v53, %v936_v55  ;;  %1141 = vst.msk [vmem:[#allocation3 + $0x18] sm:$0xff] %vm554_vm2, %v936_v55  ;;  %966 = vperm.xlu2 %1592, %v936_v55  }
 0x1b5   : > { %v947_v13 = vmul.f32 1.442695, %v940_v56 }
 0x205   : > { %v962_v57 = vpop.permute.xlu2 %961 }
 0x206   : > { %v971_v58 = vsub.f32 %v888_v35, %v962_v57 }
 0x208   : > { %v977_v59 = vmul.f32 1.442695, %v971_v58 }
 0x20a   : > { %1608 = vpow2.f32 %v977_v59 }
 0x20d   : > { %v967_v60 = vpop.permute.xlu2 %966 }
 0x20e   : > { %v972_v61 = vsub.f32 %v914_v37, %v967_v60 }
 0x20f   : > { %v952_v62 = vpop.permute.xlu0 %951 }
 0x210   : > { %v1609_v63 = vpop.eup %1608  ;;  %v979_v0 = vmul.f32 1.442695, %v972_v61  ;;  %v969_v1 = vsub.f32 %v836_v31, %v952_v62  ;;  %v1013_v62 = vld [vmem:[#allocation5 + $0x18] sm:$0xff] }
 0x211   : > { %1521 = vmatmul.msk.f32.vlgmr.msra.gmra.mxu2 %vm453_vm1, %v1609_v63  ;;  %v995_v2 = vsel %vm453_vm1, %v1609_v63, 0.0 }
 0x212   : > { %1610 = vpow2.f32 %v979_v0  ;;  %v973_v3 = vmul.f32 1.442695, %v969_v1  ;;  %996 = vadd.xlane.f32.xlu2 %v995_v2 }
 0x214   : > { %1612 = vpow2.f32 %v973_v3 }
 0x217   : > { %v957_v4 = vpop.permute.xlu1 %956 }
 0x218   : > { %v1611_v5 = vpop.eup %1610  ;;  %v970_v6 = vsub.f32 %v2052_v33, %v957_v4  ;;  %v1010_v4 = vld [vmem:[#allocation5] sm:$0xff] }
 0x219   : > { %1522 = vmatmul.msk.f32.vlgmr.msra.gmra.mxu3 %vm453_vm1, %v1611_v5  ;;  %v998_v7 = vsel %vm453_vm1, %v1611_v5, 0.0 }
 0x21a   : > { %v1613_v8 = vpop.eup %1612  ;;  %v975_v9 = vmul.f32 1.442695, %v970_v6  ;;  %999 = vadd.xlane.f32.xlu1 %v998_v7 }
 0x21b   : > { %1519 = vmatmul.msk.f32.vlgmr.msra.gmra.mxu0 %vm453_vm1, %v1613_v8  ;;  %v989_v10 = vsel %vm453_vm1, %v1613_v8, 0.0 }
 0x21c   : > { %1614 = vpow2.f32 %v975_v9  ;;  %990 = vadd.xlane.f32.xlu0 %v989_v10 }
 0x21d   : > { %1616 = vpow2.f32 %v947_v13 }
 0x21e   : > { %1618 = vpow2.f32 %v945_v14 }
 0x21f   : > { %1620 = vpow2.f32 %v941_v16 }
 0x220   : > { %1622 = vpow2.f32 %v943_v18 }
 0x222   : > { %v1615_v11 = vpop.eup %1614 }
 0x223   : > { %1520 = vmatmul.msk.f32.vlgmr.msra.gmra.mxu1 %vm453_vm1, %v1615_v11  ;;  %v992_v12 = vsel %vm453_vm1, %v1615_v11, 0.0  ;;  %v1617_v15 = vpop.eup %1616 }
 0x224   : > { %993 = vadd.xlane.f32.xlu2 %v992_v12  ;;  %v1619_v17 = vpop.eup %1618  ;;  %v988_v27 = vmul.f32 %v1617_v15, %v984_v25 }
 0x225   : > { %v1621_v19 = vpop.eup %1620  ;;  %v987_v22 = vmul.f32 %v1619_v17, %v983_v21 }
 0x226   : > { %v1623_v20 = vpop.eup %1622  ;;  %v985_v30 = vmul.f32 %v1621_v19, %v981_v26  ;;  %v1011_v26 = vld [vmem:[#allocation5 + $0x8] sm:$0xff] }
 0x227   : > { %v986_v36 = vmul.f32 %v1623_v20, %v982_v34 }
 0x233   : > { %1031 = vperm.xlu1 %1594, %v1617_v15  }
 0x23c   : > { %1026 = vperm.xlu2 %1592, %v1619_v17  }
 0x244   : > { %1016 = vperm.xlu2 %1592, %v1621_v19  }
 0x24c   : > { %1021 = vperm.xlu2 %1592, %v1623_v20  }
 0x285   : > { %v997_v23 = vpop.xlane.xlu2 %996 }
 0x286   : > { %v1003_v24 = vadd.f32 %v997_v23, %v987_v22 }
 0x288   : > { %1008 = vst.msk [vmem:[#allocation4 + $0x10] sm:$0xff] %vm554_vm2, %v1003_v24 }
 0x28d   : > { %v1000_v28 = vpop.xlane.xlu1 %999 }
 0x28e   : > { %v1004_v29 = vadd.f32 %v1000_v28, %v988_v27 }
 0x28f   : > { %v991_v31 = vpop.xlane.xlu0 %990  ;;  %v1147_v32 = vld [vmem:[#allocation4 + $0x10] sm:$0xff] }
 0x290   : > { %1009 = vst.msk [vmem:[#allocation4 + $0x18] sm:$0xff] %vm554_vm2, %v1004_v29  ;;  %v1001_v33 = vadd.f32 %v991_v31, %v985_v30  ;;  %1624 = vrcp.f32 %v1147_v32  ;;  %v1188_v43 = vand.u32 2147483648, %v1147_v32  ;;  %v1186_v45 = vand.u32 2147483647, %v1147_v32 }
 0x291   : > { %vm1182_vm4 = vweird.f32 %v1147_v32 }
 0x292   : > { %1006 = vst.msk [vmem:[#allocation4] sm:$0xff] %vm554_vm2, %v1001_v33  ;;  %v1189_v49 = vor.u32 1.1754944e-38, %v1188_v43  ;;  %vm1187_vm6 = vcmp.eq.f32.partialorder %v1186_v45, 8.507059e+37 }
 0x294   : > { %v1104_v56 = vpop.f32.mrf.mxu2 }
 0x296   : > { %v1625_v35 = vpop.eup %1624 }
 0x297   : > { %v994_v37 = vpop.xlane.xlu2 %993  ;;  %v1178_v38 = vmul.f32 %v1625_v35, %v1147_v32  ;;  %v1148_v39 = vld [vmem:[#allocation4 + $0x18] sm:$0xff]  ;;  %vm1183_vm3 = vweird.f32 %v1625_v35 }
 0x298   : > { %v1002_v40 = vadd.f32 %v994_v37, %v986_v36  ;;  %1626 = vrcp.f32 %v1148_v39  ;;  %vm1184_vm5 = vmor %vm1182_vm4, %vm1183_vm3  ;;  %v1202_v61 = vand.u32 2147483648, %v1148_v39  ;;  %v1200_v0 = vand.u32 2147483647, %v1148_v39  ;;  %v1058_v19 = vpop.f32.mrf.mxu0  ;;  %v1528_v37 = vld [vmem:[%s2149_s5 + $0x18] sm:$0xff] }
 0x299   : > { %v1179_v41 = vsub.f32 1.0, %v1178_v38  ;;  %v1145_v42 = vld [vmem:[#allocation4] sm:$0xff]  ;;  %vm1196_vm8 = vweird.f32 %v1148_v39  ;;  %1328 = vmatpush.msrb.mxu3 %v1528_v37  ;;  %v1523_v38 = vld [vmem:[%s2149_s5 + $0x8] sm:$0xff] }
 0x29a   : > { %1007 = vst.msk [vmem:[#allocation4 + $0x8] sm:$0xff] %vm554_vm2, %v1002_v40  ;;  %1628 = vrcp.f32 %v1145_v42  ;;  %v1160_v2 = vand.u32 2147483648, %v1145_v42  ;;  %v1158_v7 = vand.u32 2147483647, %v1145_v42  ;;  %v1203_v9 = vor.u32 1.1754944e-38, %v1202_v61  ;;  %1254 = vmatpush.msrb.mxu0 %v1523_v38  ;;  %v1233_v40 = vld [vmem:[%s2149_s5] sm:$0xff] }
 0x29b   : > { %v1180_v44 = vmul.f32 %v1625_v35, %v1179_v41  ;;  %vm1201_vm11 = vcmp.eq.f32.partialorder %v1200_v0, 8.507059e+37  ;;  %vm1154_vm12 = vweird.f32 %v1145_v42  ;;  %1277 = vmatpush.msrb.mxu1 %v1233_v40 }
 0x29c   : > { %v1127_v10 = vpop.f32.mrf.mxu3  ;;  %v1161_v18 = vor.u32 1.1754944e-38, %v1160_v2  ;;  %vm1159_vm14 = vcmp.eq.f32.partialorder %v1158_v7, 8.507059e+37 }
 0x29d   : > { %v1181_v47 = vadd.f32 %v1625_v35, %v1180_v44 }
 0x29e   : > { %v1627_v48 = vpop.eup %1626 }
 0x29f   : > { %v1027_v50 = vpop.permute.xlu2 %1026  ;;  %v1185_v51 = vsel %vm1184_vm5, %v1625_v35, %v1181_v47  ;;  %v1192_v52 = vmul.f32 %v1627_v48, %v1148_v39  ;;  %vm1197_vm7 = vweird.f32 %v1627_v48  ;;  %v1526_v39 = vld [vmem:[%s2149_s5 + $0x10] sm:$0xff] }
 0x2a0   : > { %v1629_v53 = vpop.eup %1628  ;;  %v1036_v54 = vmul.f32 %v1027_v50, %v1012_v46  ;;  %v1190_v55 = vsel %vm1187_vm6, %v1189_v49, %v1185_v51  ;;  %vm1198_vm10 = vmor %vm1196_vm8, %vm1197_vm7  ;;  %v1081_v33 = vpop.f32.mrf.mxu1  ;;  %1302 = vmatpush.msrb.mxu2 %v1526_v39 }
 0x2a1   : > { %1221 = vperm.xlu0 %1593, %v1190_v55   ;;  %v1193_v57 = vsub.f32 1.0, %v1192_v52  ;;  %v1150_v58 = vmul.f32 %v1629_v53, %v1145_v42  ;;  %v1146_v59 = vld [vmem:[#allocation4 + $0x8] sm:$0xff]  ;;  %vm1155_vm9 = vweird.f32 %v1629_v53 }
 0x2a2   : > { %v1132_v60 = vadd.f32 %v1104_v56, %v1036_v54  ;;  %1630 = vrcp.f32 %v1146_v59  ;;  %vm1156_vm13 = vmor %vm1154_vm12, %vm1155_vm9  ;;  %v1174_v25 = vand.u32 2147483648, %v1146_v59  ;;  %v1172_v28 = vand.u32 2147483647, %v1146_v59 }
 0x2a3   : > { %v1194_v63 = vmul.f32 %v1627_v48, %v1193_v57  ;;  %v1151_v1 = vsub.f32 1.0, %v1150_v58  ;;  %vm1168_vm0 = vweird.f32 %v1146_v59  ;;  %v1607_v58 = vld [vmem:[%s2153_s9] ss:$0 sm:$0xff] }
 0x2a4   : > { %1136 = vst.msk [vmem:[#allocation5 + $0x10] sm:$0xff] %vm453_vm1, %v1132_v60  ;;  %v1175_v32 = vor.u32 1.1754944e-38, %v1174_v25  ;;  %vm1173_vm3 = vcmp.eq.f32.partialorder %v1172_v28, 8.507059e+37 }
 0x2a5   : > { %v1032_v3 = vpop.permute.xlu1 %1031  ;;  %v1195_v5 = vadd.f32 %v1627_v48, %v1194_v63  ;;  %v1152_v6 = vmul.f32 %v1629_v53, %v1151_v1 }
 0x2a6   : > { %v1037_v8 = vmul.f32 %v1032_v3, %v1013_v62 }
 0x2a7   : > { %v1017_v11 = vpop.permute.xlu2 %1016  ;;  %v1199_v12 = vsel %vm1198_vm10, %v1627_v48, %v1195_v5  ;;  %v1153_v13 = vadd.f32 %v1629_v53, %v1152_v6 }
 0x2a8   : > { %v1631_v14 = vpop.eup %1630  ;;  %v1133_v15 = vadd.f32 %v1127_v10, %v1037_v8  ;;  %v1034_v16 = vmul.f32 %v1017_v11, %v1010_v4  ;;  %v1204_v17 = vsel %vm1201_vm11, %v1203_v9, %v1199_v12 }
 0x2a9   : > { %1226 = vperm.xlu2 %1592, %v1204_v17   ;;  %v1157_v20 = vsel %vm1156_vm13, %v1629_v53, %v1153_v13  ;;  %v1164_v21 = vmul.f32 %v1631_v14, %v1146_v59  ;;  %vm1169_vm15 = vweird.f32 %v1631_v14 }
 0x2aa   : > { %1137 = vst.msk [vmem:[#allocation5 + $0x18] sm:$0xff] %vm453_vm1, %v1133_v15  ;;  %v1130_v22 = vadd.f32 %v1058_v19, %v1034_v16  ;;  %v1162_v23 = vsel %vm1159_vm14, %v1161_v18, %v1157_v20  ;;  %vm1170_vm2 = vmor %vm1168_vm0, %vm1169_vm15 }
 0x2ab   : > { %1211 = vperm.xlu1 %1594, %v1162_v23   ;;  %v1165_v24 = vsub.f32 1.0, %v1164_v21  ;;  %v1207_v48 = vld [vmem:[#allocation5 + $0x10] sm:$0xff] }
 0x2ac   : > { %1134 = vst.msk [vmem:[#allocation5] sm:$0xff] %vm453_vm1, %v1130_v22 }
 0x2ad   : > { %v1166_v27 = vmul.f32 %v1631_v14, %v1165_v24 }
 0x2af   : > { %v1022_v29 = vpop.permute.xlu2 %1021  ;;  %v1167_v30 = vadd.f32 %v1631_v14, %v1166_v27 }
 0x2b0   : > { %v1035_v31 = vmul.f32 %v1022_v29, %v1011_v26 }
 0x2b1   : > { %v1171_v34 = vsel %vm1170_vm2, %v1631_v14, %v1167_v30  ;;  %v1208_v41 = vld [vmem:[#allocation5 + $0x18] sm:$0xff] }
 0x2b2   : > { %v1131_v35 = vadd.f32 %v1081_v33, %v1035_v31  ;;  %v1176_v36 = vsel %vm1173_vm3, %v1175_v32, %v1171_v34 }
 0x2b3   : > { %1216 = vperm.xlu2 %1592, %v1176_v36   ;;  %v1205_v50 = vld [vmem:[#allocation5] sm:$0xff] }
 0x2b4   : > { %1135 = vst.msk [vmem:[#allocation5 + $0x8] sm:$0xff] %vm453_vm1, %v1131_v35 }
 0x2bb   : > { %v1206_v44 = vld [vmem:[#allocation5 + $0x8] sm:$0xff] }
 0x303   : > { %v1227_v42 = vpop.permute.xlu2 %1226 }
 0x304   : > { %v1232_v43 = vmul.f32 %v1227_v42, %v1208_v41 }
 0x306   : > { %1529 = vmatmul.msk.f32.vlgmr.msrb.gmra.mxu3 %vm453_vm1, %v1232_v43 }
 0x30d   : > { %v1217_v45 = vpop.permute.xlu2 %1216 }
 0x30e   : > { %v1230_v46 = vmul.f32 %v1217_v45, %v1206_v44 }
 0x310   : > { %1524 = vmatmul.msk.f32.vlgmr.msrb.gmra.mxu0 %vm453_vm1, %v1230_v46 }
 0x313   : > { %v1222_v47 = vpop.permute.xlu0 %1221 }
 0x314   : > { %v1231_v49 = vmul.f32 %v1222_v47, %v1207_v48 }
 0x316   : > { %1527 = vmatmul.msk.f32.vlgmr.msrb.gmra.mxu2 %vm453_vm1, %v1231_v49 }
 0x31d   : > { %v1212_v51 = vpop.permute.xlu1 %1211 }
 0x31e   : > { %v1229_v52 = vmul.f32 %v1212_v51, %v1205_v50 }
 0x320   : > { %1525 = vmatmul.msk.f32.vlgmr.msrb.gmra.mxu1 %vm453_vm1, %v1229_v52 }
 0x389   : > { %v1330_v59 = vpop.f32.mrf.mxu3 }
 0x38d   : > { %v1256_v53 = vpop.f32.mrf.mxu0 }
 0x399   : > { %v1304_v56 = vpop.f32.mrf.mxu2 }
 0x39d   : > { %v1279_v54 = vpop.f32.mrf.mxu1 }
 0x39e   : > { %v1280_v55 = vadd.f32 %v1279_v54, %v1256_v53 }
 0x3a0   : > { %v1307_v57 = vadd.f32 %v1304_v56, %v1280_v55 }
 0x3a2   : > { %v1333_v60 = vadd.f32 %v1330_v59, %v1307_v57 }
 0x3a4   : > { %v1338_v61 = vadd.f32 %v1607_v58, %v1333_v60 }
 0x3a6   : > { %1339 = vst [vmem:[%s400_s11] sm:$0xff] %v1338_v61 }
 0x3a7   : > { %1659 = shalt.err (!%p1656_p5)
}
 0x3a8   : > { %1534 = dma.vmem_to_hbm [thread:$0]  (%p1810_p4), %s1355_s29, 128, %s1357_s17, %s1341_s16  }
 0x3a9 PF: > { %p1540_p6 = scmp.ge.s32.totalorder %s1710_s18, 2  ;;  %s1368_s20 = sand.u32 1, %s1690_s13  }
 0x3aa   : > { %s1369_s28 = scalar_lea.sflag [#allocation7], %s1368_s20 }
 0x3ab   : > { %p1537_p7 = pnand %p1540_p6, %p1817_p8 }
 0x3ad   : > { %p1538_p9 = pneg %p1537_p7 }
 0x3af   : > { %1685 = dma.done.wait (%p1538_p9), %s1369_s28, 128  }
 0x3b0   : > { %1687 = vsyncadd (%p1538_p9), %s1369_s28, 4294967168  ;;  %s23_s18 = sadd.s32 1, %s1710_s18   ;;  %s2161_s16 = sld [smem:[#allocation9_spill]] }
 0x3b1   : > { %p20_p10 = scmp.ge.s32.totalorder %s23_s18, 4   ;;  %s2162_s17 = sld [smem:[#allocation10_spill]] }
 0x3b2   : > { %s2163_s13 = smov %s1694_s14  ;;  %s2164_s14 = smov %s1698_s15 }
 0x3b3   : > { %s2165_s15 = smov %s1823_s26  ;;  %22 = sbr.rel (!%p20_p10) target bundleno = 4 (0x4), region = 130 }
 0x3b8   :  { %1375 = vsyncpa [#allocation7], 1 }
 0x3b9   :  { %1377 = vsyncpa [#allocation7 + $0x1], 1 }

</bundles_post_ra>
